<compile_context>
chip_gen: v6e
topology: v6e:2x2x1
jax: 0.10.0
libtpu: 0.0.40
codegen_flags: <defaults>
</compile_context>

<pallas_src>
import jax
import jax.numpy as jnp
from jax.experimental import pallas as pl
from jax.experimental.pallas import tpu as pltpu


def gnn_kernel(x_ref, a_ref,
               w1_ref, b1_ref, w2_ref, b2_ref, w3_ref, b3_ref,
               wo_ref, wd_ref, so_ref, sd_ref, dis_ref,
               wdis_ref, bout_ref,
               out_ref):
    f32 = jnp.float32
    a = a_ref[...]                       # (N, N)
    x = x_ref[0]                         # (N, Tb*Fin), column = t*Fin + f

    # GraphConv 1: relu(A @ x_t @ W1 + b1), all Tb time steps in one shot.
    h = jnp.dot(jnp.dot(a, x, preferred_element_type=f32), w1_ref[...],
                preferred_element_type=f32) + b1_ref[...]
    h = jnp.maximum(h, 0.0)              # (N, Tb*H)

    # GraphConv 2
    h = jnp.dot(jnp.dot(a, h, preferred_element_type=f32), w2_ref[...],
                preferred_element_type=f32) + b2_ref[...]
    h = jnp.maximum(h, 0.0)              # (N, Tb*H)

    # GraphConv 3 + sigmoid
    g = jnp.dot(jnp.dot(a, h, preferred_element_type=f32), w3_ref[...],
                preferred_element_type=f32) + b3_ref[...]
    g = jax.nn.sigmoid(g)                # (N, Tb*emb)

    # linear_out weights folded into per-node scores, then edge gather (MXU).
    score_o = jnp.dot(g, wo_ref[...], preferred_element_type=f32)   # (N, Tb)
    score_d = jnp.dot(g, wd_ref[...], preferred_element_type=f32)   # (N, Tb)
    go = jnp.dot(so_ref[...], score_o, preferred_element_type=f32)  # (E, Tb)
    gd = jnp.dot(sd_ref[...], score_d, preferred_element_type=f32)  # (E, Tb)

    pre = go + gd + dis_ref[...] * wdis_ref[0] + bout_ref[0]        # (E, Tb)
    out_ref[0] = jnp.tanh(pre)


def gnn_forward_pallas(x, a_norm, params, s_o, s_d, dis_e, *, t_split=2):
    T, N, Fin = x.shape
    H = params["w1"].shape[1]
    emb = params["w3"].shape[1]
    E = s_o.shape[0]
    f32 = jnp.float32

    TS = t_split if (T % t_split == 0) else 1   # 2-way split feeds both v7x TCs
    Tb = T // TS

    # ---- one-time parameter / layout prep (glue) ---------------------------
    eye_tb = jnp.eye(Tb, dtype=f32)
    w1bd = jnp.kron(eye_tb, params["w1"].astype(f32))     # (Tb*Fin, Tb*H)
    w2bd = jnp.kron(eye_tb, params["w2"].astype(f32))     # (Tb*H,  Tb*H)
    w3bd = jnp.kron(eye_tb, params["w3"].astype(f32))     # (Tb*H,  Tb*emb)
    wobd = jnp.kron(eye_tb, params["wo"].astype(f32))     # (Tb*emb, Tb)
    wdbd = jnp.kron(eye_tb, params["wd"].astype(f32))     # (Tb*emb, Tb)
    b1t = jnp.tile(params["b1"].astype(f32), (1, Tb))     # (1, Tb*H)
    b2t = jnp.tile(params["b2"].astype(f32), (1, Tb))     # (1, Tb*H)
    b3t = jnp.tile(params["b3"].astype(f32), (1, Tb))     # (1, Tb*emb)
    wdis_s = params["wdis"].astype(f32).reshape(1)        # SMEM scalar
    bout_s = params["bout"].astype(f32).reshape(1)        # SMEM scalar

    # x_a[i, n, t*Fin + f] = x[i*Tb + t, n, f]   (time packed onto lanes)
    x_a = (x.astype(f32)
           .reshape(TS, Tb, N, Fin)
           .transpose(0, 2, 1, 3)
           .reshape(TS, N, Tb * Fin))

    def vconst(shape):
        return pl.BlockSpec(shape, lambda i, _s=shape: tuple(0 for _ in _s))

    smem_spec = pl.BlockSpec(memory_space=pltpu.MemorySpace.SMEM)

    out = pl.pallas_call(
        gnn_kernel,
        out_shape=jax.ShapeDtypeStruct((TS, E, Tb), f32),
        grid=(TS,),
        in_specs=[
            pl.BlockSpec((1, N, Tb * Fin), lambda i: (i, 0, 0)),  # x time-block
            vconst((N, N)),                                       # A_norm
            vconst((Tb * Fin, Tb * H)),                           # W1 block-diag
            vconst((1, Tb * H)),                                  # b1 tiled
            vconst((Tb * H, Tb * H)),                             # W2 block-diag
            vconst((1, Tb * H)),                                  # b2 tiled
            vconst((Tb * H, Tb * emb)),                           # W3 block-diag
            vconst((1, Tb * emb)),                                # b3 tiled
            vconst((Tb * emb, Tb)),                               # wo block-diag
            vconst((Tb * emb, Tb)),                               # wd block-diag
            vconst((E, N)),                                       # S_o one-hot
            vconst((E, N)),                                       # S_d one-hot
            vconst((E, 1)),                                       # gathered dis
            smem_spec,                                            # wdis scalar
            smem_spec,                                            # bout scalar
        ],
        out_specs=pl.BlockSpec((1, E, Tb), lambda i: (i, 0, 0)),
        compiler_params=pltpu.CompilerParams(
            dimension_semantics=("parallel",)),
    )(x_a, a_norm.astype(f32),
      w1bd, b1t, w2bd, b2t, w3bd, b3t,
      wobd, wdbd,
      s_o.astype(f32), s_d.astype(f32), dis_e.astype(f32),
      wdis_s, bout_s)

    # (TS, E, Tb) -> (E, T)  == torch.stack(pres, dim=1)
    return out.transpose(1, 0, 2).reshape(E, T)


def gnn_forward_ref(x, a_norm, params, idx_o, idx_d, dis):
    """Pure-JAX reference of the PyTorch forward pass."""
    def one_step(xt):
        h = jax.nn.relu(a_norm @ (xt @ params["w1"]) + params["b1"])
        h = jax.nn.relu(a_norm @ (h @ params["w2"]) + params["b2"])
        g_emb = jax.nn.sigmoid(a_norm @ (h @ params["w3"]) + params["b3"])
        o_emb = g_emb[idx_o]
        d_emb = g_emb[idx_d]
        dis_emb = dis[idx_o, idx_d].reshape(-1, 1)
        cat = jnp.concatenate([o_emb, d_emb, dis_emb], axis=1)
        w_cat = jnp.concatenate([params["wo"], params["wd"], params["wdis"]], axis=0)
        return jnp.tanh(cat @ w_cat + params["bout"])[:, 0]
    pres = jax.vmap(one_step)(x)          # [T, E]
    return pres.T                         # [E, T]


if __name__ == "__main__":
    # GNN_in_dim=8, GNN_hid_dim=32, node_embsize=16, N=16 nodes, E=8 pairs, T=24
    T, N, Fin, H, emb, E = 24, 16, 8, 32, 16, 8

    key = jax.random.PRNGKey(0)
    ks = jax.random.split(key, 12)

    # node features for each of the 24 time steps
    x = jax.random.normal(ks[0], (T, N, Fin), dtype=jnp.float32)

    # synthetic undirected graph -> symmetric-normalized dense adjacency
    adj = (jax.random.uniform(ks[1], (N, N)) < 0.3).astype(jnp.float32)
    adj = jnp.maximum(adj, adj.T)
    adj = adj * (1.0 - jnp.eye(N, dtype=jnp.float32))
    deg = jnp.clip(adj.sum(axis=1), 1.0, None)
    dinv = 1.0 / jnp.sqrt(deg)
    a_norm = (dinv[:, None] * adj * dinv[None, :]).astype(jnp.float32)

    # deterministic parameters (GraphConv weights/biases + linear_out split)
    params = {
        "w1": 0.3 * jax.random.normal(ks[2], (Fin, H), dtype=jnp.float32),
        "b1": 0.1 * jax.random.normal(ks[3], (1, H), dtype=jnp.float32),
        "w2": 0.3 * jax.random.normal(ks[4], (H, H), dtype=jnp.float32),
        "b2": 0.1 * jax.random.normal(ks[5], (1, H), dtype=jnp.float32),
        "w3": 0.3 * jax.random.normal(ks[6], (H, emb), dtype=jnp.float32),
        "b3": 0.1 * jax.random.normal(ks[7], (1, emb), dtype=jnp.float32),
        # linear_out: weight [2*emb+1, 1] split into origin / dest / dis parts
        "wo": 0.3 * jax.random.normal(ks[8], (emb, 1), dtype=jnp.float32),
        "wd": 0.3 * jax.random.normal(ks[9], (emb, 1), dtype=jnp.float32),
        "wdis": 0.3 * jax.random.normal(ks[10], (1, 1), dtype=jnp.float32),
        "bout": 0.1 * jnp.ones((1, 1), dtype=jnp.float32),
    }

    # train_idx = (origin nodes, destination nodes); dis = [N, N] distances
    idx_o = jnp.arange(E, dtype=jnp.int32) % N
    idx_d = (jnp.arange(E, dtype=jnp.int32) * 3 + 1) % N
    dis = jax.random.uniform(ks[11], (N, N), dtype=jnp.float32)

    # glue: one-hot gather matrices and pre-gathered distances (index setup)
    s_o = jax.nn.one_hot(idx_o, N, dtype=jnp.float32)   # (E, N)
    s_d = jax.nn.one_hot(idx_d, N, dtype=jnp.float32)   # (E, N)
    dis_e = dis[idx_o, idx_d].reshape(E, 1)

    pres = gnn_forward_pallas(x, a_norm, params, s_o, s_d, dis_e)
    pres = jax.block_until_ready(pres)

    ref = gnn_forward_ref(x, a_norm, params, idx_o, idx_d, dis)
    assert pres.shape == (E, T)
    assert jnp.allclose(pres, ref, atol=1e-4, rtol=1e-4)

    print("KERNEL_OK")
</pallas_src>

<mosaic_0001>
module attributes {stable_mosaic.version = 11 : i64} {
  func.func @gnn_kernel(%arg0: i32, %arg1: memref<1x16x96xf32, #tpu.memory_space<vmem>>, %arg2: memref<16x16xf32, #tpu.memory_space<vmem>>, %arg3: memref<96x384xf32, #tpu.memory_space<vmem>>, %arg4: memref<1x384xf32, #tpu.memory_space<vmem>>, %arg5: memref<384x384xf32, #tpu.memory_space<vmem>>, %arg6: memref<1x384xf32, #tpu.memory_space<vmem>>, %arg7: memref<384x192xf32, #tpu.memory_space<vmem>>, %arg8: memref<1x192xf32, #tpu.memory_space<vmem>>, %arg9: memref<192x12xf32, #tpu.memory_space<vmem>>, %arg10: memref<192x12xf32, #tpu.memory_space<vmem>>, %arg11: memref<8x16xf32, #tpu.memory_space<vmem>>, %arg12: memref<8x16xf32, #tpu.memory_space<vmem>>, %arg13: memref<8x1xf32, #tpu.memory_space<vmem>>, %arg14: memref<1xf32, #tpu.memory_space<smem>>, %arg15: memref<1xf32, #tpu.memory_space<smem>>, %arg16: memref<1x8x12xf32, #tpu.memory_space<vmem>>) attributes {dimension_semantics = [#tpu.dimension_semantics<parallel>], iteration_bounds = array<i64: 2>, scalar_prefetch = 0 : i64, scratch_operands = 0 : i64, tpu.core_type = #tpu.core_type<tc>, window_params = [{transform_indices = @transform_0, window_bounds = array<i64: 1, 16, 96>}, {pipeline_mode = #tpu.pipeline_mode<synchronous>, transform_indices = @transform_1, window_bounds = array<i64: 16, 16>}, {pipeline_mode = #tpu.pipeline_mode<synchronous>, transform_indices = @transform_2, window_bounds = array<i64: 96, 384>}, {pipeline_mode = #tpu.pipeline_mode<synchronous>, transform_indices = @transform_3, window_bounds = array<i64: 1, 384>}, {pipeline_mode = #tpu.pipeline_mode<synchronous>, transform_indices = @transform_4, window_bounds = array<i64: 384, 384>}, {pipeline_mode = #tpu.pipeline_mode<synchronous>, transform_indices = @transform_5, window_bounds = array<i64: 1, 384>}, {pipeline_mode = #tpu.pipeline_mode<synchronous>, transform_indices = @transform_6, window_bounds = array<i64: 384, 192>}, {pipeline_mode = #tpu.pipeline_mode<synchronous>, transform_indices = @transform_7, window_bounds = array<i64: 1, 192>}, {pipeline_mode = #tpu.pipeline_mode<synchronous>, transform_indices = @transform_8, window_bounds = array<i64: 192, 12>}, {pipeline_mode = #tpu.pipeline_mode<synchronous>, transform_indices = @transform_9, window_bounds = array<i64: 192, 12>}, {pipeline_mode = #tpu.pipeline_mode<synchronous>, transform_indices = @transform_10, window_bounds = array<i64: 8, 16>}, {pipeline_mode = #tpu.pipeline_mode<synchronous>, transform_indices = @transform_11, window_bounds = array<i64: 8, 16>}, {pipeline_mode = #tpu.pipeline_mode<synchronous>, transform_indices = @transform_12, window_bounds = array<i64: 8, 1>}, {transform_indices = @transform_13, window_bounds = array<i64: 1>}, {transform_indices = @transform_14, window_bounds = array<i64: 1>}, {transform_indices = @transform_15, window_bounds = array<i64: 1, 8, 12>}]} {
    %c0 = arith.constant 0 : index
    %c0_0 = arith.constant 0 : index
    %0 = vector.load %arg2[%c0, %c0_0] : memref<16x16xf32, #tpu.memory_space<vmem>>, vector<16x16xf32>
    %c0_1 = arith.constant 0 : index
    %c0_2 = arith.constant 0 : index
    %c0_3 = arith.constant 0 : index
    %1 = vector.load %arg1[%c0_1, %c0_2, %c0_3] : memref<1x16x96xf32, #tpu.memory_space<vmem>>, vector<1x16x96xf32>
    %2 = vector.shape_cast %1 : vector<1x16x96xf32> to vector<16x96xf32>
    %cst = arith.constant dense<0.000000e+00> : vector<16x96xf32>
    %3 = tpu.matmul %0, %2, %cst {dimension_numbers = #tpu.dot_dimension_numbers<[1], [0], [0], [1], [0, 0, 1, 1], [], []>} : vector<16x16xf32>, vector<16x96xf32>, vector<16x96xf32> -> vector<16x96xf32>
    %c0_4 = arith.constant 0 : index
    %c0_5 = arith.constant 0 : index
    %4 = vector.load %arg3[%c0_4, %c0_5] : memref<96x384xf32, #tpu.memory_space<vmem>>, vector<96x384xf32>
    %cst_6 = arith.constant dense<0.000000e+00> : vector<16x384xf32>
    %5 = tpu.matmul %3, %4, %cst_6 {dimension_numbers = #tpu.dot_dimension_numbers<[1], [0], [0], [1], [0, 0, 1, 1], [], []>} : vector<16x96xf32>, vector<96x384xf32>, vector<16x384xf32> -> vector<16x384xf32>
    %c0_7 = arith.constant 0 : index
    %c0_8 = arith.constant 0 : index
    %6 = vector.load %arg4[%c0_7, %c0_8] : memref<1x384xf32, #tpu.memory_space<vmem>>, vector<1x384xf32>
    %7 = vector.broadcast %6 : vector<1x384xf32> to vector<16x384xf32>
    %8 = arith.addf %5, %7 : vector<16x384xf32>
    %cst_9 = arith.constant 0.000000e+00 : f32
    %9 = vector.broadcast %cst_9 : f32 to vector<16x384xf32>
    %10 = arith.maximumf %8, %9 : vector<16x384xf32>
    %cst_10 = arith.constant dense<0.000000e+00> : vector<16x384xf32>
    %11 = tpu.matmul %0, %10, %cst_10 {dimension_numbers = #tpu.dot_dimension_numbers<[1], [0], [0], [1], [0, 0, 1, 1], [], []>} : vector<16x16xf32>, vector<16x384xf32>, vector<16x384xf32> -> vector<16x384xf32>
    %c0_11 = arith.constant 0 : index
    %c0_12 = arith.constant 0 : index
    %12 = vector.load %arg5[%c0_11, %c0_12] : memref<384x384xf32, #tpu.memory_space<vmem>>, vector<384x384xf32>
    %cst_13 = arith.constant dense<0.000000e+00> : vector<16x384xf32>
    %13 = tpu.matmul %11, %12, %cst_13 {dimension_numbers = #tpu.dot_dimension_numbers<[1], [0], [0], [1], [0, 0, 1, 1], [], []>} : vector<16x384xf32>, vector<384x384xf32>, vector<16x384xf32> -> vector<16x384xf32>
    %c0_14 = arith.constant 0 : index
    %c0_15 = arith.constant 0 : index
    %14 = vector.load %arg6[%c0_14, %c0_15] : memref<1x384xf32, #tpu.memory_space<vmem>>, vector<1x384xf32>
    %15 = vector.broadcast %14 : vector<1x384xf32> to vector<16x384xf32>
    %16 = arith.addf %13, %15 : vector<16x384xf32>
    %cst_16 = arith.constant 0.000000e+00 : f32
    %17 = vector.broadcast %cst_16 : f32 to vector<16x384xf32>
    %18 = arith.maximumf %16, %17 : vector<16x384xf32>
    %cst_17 = arith.constant dense<0.000000e+00> : vector<16x384xf32>
    %19 = tpu.matmul %0, %18, %cst_17 {dimension_numbers = #tpu.dot_dimension_numbers<[1], [0], [0], [1], [0, 0, 1, 1], [], []>} : vector<16x16xf32>, vector<16x384xf32>, vector<16x384xf32> -> vector<16x384xf32>
    %c0_18 = arith.constant 0 : index
    %c0_19 = arith.constant 0 : index
    %20 = vector.load %arg7[%c0_18, %c0_19] : memref<384x192xf32, #tpu.memory_space<vmem>>, vector<384x192xf32>
    %cst_20 = arith.constant dense<0.000000e+00> : vector<16x192xf32>
    %21 = tpu.matmul %19, %20, %cst_20 {dimension_numbers = #tpu.dot_dimension_numbers<[1], [0], [0], [1], [0, 0, 1, 1], [], []>} : vector<16x384xf32>, vector<384x192xf32>, vector<16x192xf32> -> vector<16x192xf32>
    %c0_21 = arith.constant 0 : index
    %c0_22 = arith.constant 0 : index
    %22 = vector.load %arg8[%c0_21, %c0_22] : memref<1x192xf32, #tpu.memory_space<vmem>>, vector<1x192xf32>
    %23 = vector.broadcast %22 : vector<1x192xf32> to vector<16x192xf32>
    %24 = arith.addf %21, %23 : vector<16x192xf32>
    %25 = arith.negf %24 : vector<16x192xf32>
    %26 = math.exp %25 : vector<16x192xf32>
    %cst_23 = arith.constant 1.000000e+00 : f32
    %27 = vector.broadcast %cst_23 : f32 to vector<16x192xf32>
    %28 = arith.addf %27, %26 : vector<16x192xf32>
    %29 = arith.divf %27, %28 : vector<16x192xf32>
    %c0_24 = arith.constant 0 : index
    %c0_25 = arith.constant 0 : index
    %30 = vector.load %arg9[%c0_24, %c0_25] : memref<192x12xf32, #tpu.memory_space<vmem>>, vector<192x12xf32>
    %cst_26 = arith.constant dense<0.000000e+00> : vector<16x12xf32>
    %31 = tpu.matmul %29, %30, %cst_26 {dimension_numbers = #tpu.dot_dimension_numbers<[1], [0], [0], [1], [0, 0, 1, 1], [], []>} : vector<16x192xf32>, vector<192x12xf32>, vector<16x12xf32> -> vector<16x12xf32>
    %c0_27 = arith.constant 0 : index
    %c0_28 = arith.constant 0 : index
    %32 = vector.load %arg10[%c0_27, %c0_28] : memref<192x12xf32, #tpu.memory_space<vmem>>, vector<192x12xf32>
    %cst_29 = arith.constant dense<0.000000e+00> : vector<16x12xf32>
    %33 = tpu.matmul %29, %32, %cst_29 {dimension_numbers = #tpu.dot_dimension_numbers<[1], [0], [0], [1], [0, 0, 1, 1], [], []>} : vector<16x192xf32>, vector<192x12xf32>, vector<16x12xf32> -> vector<16x12xf32>
    %c0_30 = arith.constant 0 : index
    %c0_31 = arith.constant 0 : index
    %34 = vector.load %arg11[%c0_30, %c0_31] : memref<8x16xf32, #tpu.memory_space<vmem>>, vector<8x16xf32>
    %cst_32 = arith.constant dense<0.000000e+00> : vector<8x12xf32>
    %35 = tpu.matmul %34, %31, %cst_32 {dimension_numbers = #tpu.dot_dimension_numbers<[1], [0], [0], [1], [0, 0, 1, 1], [], []>} : vector<8x16xf32>, vector<16x12xf32>, vector<8x12xf32> -> vector<8x12xf32>
    %c0_33 = arith.constant 0 : index
    %c0_34 = arith.constant 0 : index
    %36 = vector.load %arg12[%c0_33, %c0_34] : memref<8x16xf32, #tpu.memory_space<vmem>>, vector<8x16xf32>
    %cst_35 = arith.constant dense<0.000000e+00> : vector<8x12xf32>
    %37 = tpu.matmul %36, %33, %cst_35 {dimension_numbers = #tpu.dot_dimension_numbers<[1], [0], [0], [1], [0, 0, 1, 1], [], []>} : vector<8x16xf32>, vector<16x12xf32>, vector<8x12xf32> -> vector<8x12xf32>
    %38 = arith.addf %35, %37 : vector<8x12xf32>
    %c0_36 = arith.constant 0 : index
    %c0_37 = arith.constant 0 : index
    %39 = vector.load %arg13[%c0_36, %c0_37] : memref<8x1xf32, #tpu.memory_space<vmem>>, vector<8x1xf32>
    %c0_38 = arith.constant 0 : index
    %40 = memref.load %arg14[%c0_38] : memref<1xf32, #tpu.memory_space<smem>>
    %41 = vector.broadcast %40 : f32 to vector<8x1xf32>
    %42 = arith.mulf %39, %41 : vector<8x1xf32>
    %43 = vector.broadcast %42 : vector<8x1xf32> to vector<8x12xf32>
    %44 = arith.addf %38, %43 : vector<8x12xf32>
    %c0_39 = arith.constant 0 : index
    %45 = memref.load %arg15[%c0_39] : memref<1xf32, #tpu.memory_space<smem>>
    %46 = vector.broadcast %45 : f32 to vector<8x12xf32>
    %47 = arith.addf %44, %46 : vector<8x12xf32>
    %48 = math.tanh %47 : vector<8x12xf32>
    %c0_40 = arith.constant 0 : index
    %c0_41 = arith.constant 0 : index
    %c0_42 = arith.constant 0 : index
    %49 = vector.load %arg16[%c0_40, %c0_41, %c0_42] : memref<1x8x12xf32, #tpu.memory_space<vmem>>, vector<1x8x12xf32>
    %50 = vector.shape_cast %49 : vector<1x8x12xf32> to vector<8x12xf32>
    %51 = vector.shape_cast %48 : vector<8x12xf32> to vector<1x8x12xf32>
    tpu.vector_store %arg16[%c0_40, %c0_41, %c0_42], %51 {strides = array<i32>} : memref<1x8x12xf32, #tpu.memory_space<vmem>>, vector<1x8x12xf32>,
    return
  }
  func.func @transform_0(%arg0: i32) -> (i32, i32, i32) {
    %c0_i32 = arith.constant 0 : i32
    %c0_i32_0 = arith.constant 0 : i32
    %c0_i32_1 = arith.constant 0 : i32
    return %arg0, %c0_i32, %c0_i32_0 : i32, i32, i32
  }
  func.func @transform_1(%arg0: i32) -> (i32, i32) {
    %c0_i32 = arith.constant 0 : i32
    %c0_i32_0 = arith.constant 0 : i32
    %c0_i32_1 = arith.constant 0 : i32
    return %c0_i32, %c0_i32_0 : i32, i32
  }
  func.func @transform_2(%arg0: i32) -> (i32, i32) {
    %c0_i32 = arith.constant 0 : i32
    %c0_i32_0 = arith.constant 0 : i32
    %c0_i32_1 = arith.constant 0 : i32
    return %c0_i32, %c0_i32_0 : i32, i32
  }
  func.func @transform_3(%arg0: i32) -> (i32, i32) {
    %c0_i32 = arith.constant 0 : i32
    %c0_i32_0 = arith.constant 0 : i32
    %c0_i32_1 = arith.constant 0 : i32
    return %c0_i32, %c0_i32_0 : i32, i32
  }
  func.func @transform_4(%arg0: i32) -> (i32, i32) {
    %c0_i32 = arith.constant 0 : i32
    %c0_i32_0 = arith.constant 0 : i32
    %c0_i32_1 = arith.constant 0 : i32
    return %c0_i32, %c0_i32_0 : i32, i32
  }
  func.func @transform_5(%arg0: i32) -> (i32, i32) {
    %c0_i32 = arith.constant 0 : i32
    %c0_i32_0 = arith.constant 0 : i32
    %c0_i32_1 = arith.constant 0 : i32
    return %c0_i32, %c0_i32_0 : i32, i32
  }
  func.func @transform_6(%arg0: i32) -> (i32, i32) {
    %c0_i32 = arith.constant 0 : i32
    %c0_i32_0 = arith.constant 0 : i32
    %c0_i32_1 = arith.constant 0 : i32
    return %c0_i32, %c0_i32_0 : i32, i32
  }
  func.func @transform_7(%arg0: i32) -> (i32, i32) {
    %c0_i32 = arith.constant 0 : i32
    %c0_i32_0 = arith.constant 0 : i32
    %c0_i32_1 = arith.constant 0 : i32
    return %c0_i32, %c0_i32_0 : i32, i32
  }
  func.func @transform_8(%arg0: i32) -> (i32, i32) {
    %c0_i32 = arith.constant 0 : i32
    %c0_i32_0 = arith.constant 0 : i32
    %c0_i32_1 = arith.constant 0 : i32
    return %c0_i32, %c0_i32_0 : i32, i32
  }
  func.func @transform_9(%arg0: i32) -> (i32, i32) {
    %c0_i32 = arith.constant 0 : i32
    %c0_i32_0 = arith.constant 0 : i32
    %c0_i32_1 = arith.constant 0 : i32
    return %c0_i32, %c0_i32_0 : i32, i32
  }
  func.func @transform_10(%arg0: i32) -> (i32, i32) {
    %c0_i32 = arith.constant 0 : i32
    %c0_i32_0 = arith.constant 0 : i32
    %c0_i32_1 = arith.constant 0 : i32
    return %c0_i32, %c0_i32_0 : i32, i32
  }
  func.func @transform_11(%arg0: i32) -> (i32, i32) {
    %c0_i32 = arith.constant 0 : i32
    %c0_i32_0 = arith.constant 0 : i32
    %c0_i32_1 = arith.constant 0 : i32
    return %c0_i32, %c0_i32_0 : i32, i32
  }
  func.func @transform_12(%arg0: i32) -> (i32, i32) {
    %c0_i32 = arith.constant 0 : i32
    %c0_i32_0 = arith.constant 0 : i32
    %c0_i32_1 = arith.constant 0 : i32
    return %c0_i32, %c0_i32_0 : i32, i32
  }
  func.func @transform_13(%arg0: i32) -> i32 {
    %c0_i32 = arith.constant 0 : i32
    %c0_i32_0 = arith.constant 0 : i32
    return %c0_i32 : i32
  }
  func.func @transform_14(%arg0: i32) -> i32 {
    %c0_i32 = arith.constant 0 : i32
    %c0_i32_0 = arith.constant 0 : i32
    return %c0_i32 : i32
  }
  func.func @transform_15(%arg0: i32) -> (i32, i32, i32) {
    %c0_i32 = arith.constant 0 : i32
    %c0_i32_0 = arith.constant 0 : i32
    %c0_i32_1 = arith.constant 0 : i32
    return %arg0, %c0_i32, %c0_i32_0 : i32, i32, i32
  }
}

</mosaic_0001>

<bundles_post_ra>
// kernel: tpu_custom_call.1
= control target key start
LH: loop header
LB: loop body
LE: loop exit
PB: predicated region body
PF: predicated region fallthrough
CT: control target
= control target key end

     0   :  { %s3960_s0 = inlined_call_operand.vmem [shape: f32[2,16,96], index: 0, kind: input, shape index: {}]   ;;  %s3961_s1 = inlined_call_operand.vmem [shape: f32[16,16], index: 1, kind: input, shape index: {}]   ;;  %s3962_s2 = inlined_call_operand.vmem [shape: f32[96,384], index: 2, kind: input, shape index: {}]   ;;  %s3963_s3 = inlined_call_operand.vmem [shape: f32[1,384], index: 3, kind: input, shape index: {}]   ;;  %s3964_s4 = inlined_call_operand.vmem [shape: f32[384,384], index: 4, kind: input, shape index: {}]   ;;  %s3965_s5 = inlined_call_operand.vmem [shape: f32[1,384], index: 5, kind: input, shape index: {}]   ;;  %s3966_s6 = inlined_call_operand.vmem [shape: f32[384,192], index: 6, kind: input, shape index: {}]   ;;  %s3967_s7 = inlined_call_operand.vmem [shape: f32[1,192], index: 7, kind: input, shape index: {}]   ;;  %s3968_s8 = inlined_call_operand.vmem [shape: f32[192,12], index: 8, kind: input, shape index: {}]   ;;  %s3969_s9 = inlined_call_operand.vmem [shape: f32[192,12], index: 9, kind: input, shape index: {}]   ;;  %s3970_s10 = inlined_call_operand.vmem [shape: f32[8,16], index: 10, kind: input, shape index: {}]   ;;  %s3971_s11 = inlined_call_operand.vmem [shape: f32[8,16], index: 11, kind: input, shape index: {}]   ;;  %s3972_s12 = inlined_call_operand.vmem [shape: f32[8,1], index: 12, kind: input, shape index: {}]   ;;  %s3973_s13 = inlined_call_operand.<no memory space> [shape: f32[1], index: 13, kind: input, shape index: {}]   ;;  %s3974_s14 = inlined_call_operand.<no memory space> [shape: f32[1], index: 14, kind: input, shape index: {}]   ;;  %s3975_s15 = inlined_call_operand.hbm [shape: f32[2,8,12], index: 15, kind: output, shape index: {}]  }
   0x1   :  { %20 = sst [smem:[#allocation2]] %s3973_s13 }
   0x2   :  { %21 = sst [smem:[#allocation3]] %s3974_s14 }
   0x3   :  { %22 = vsyncpa [#allocation5], 0 }
   0x4   :  { %24 = vsyncpa [#allocation5 + $0x1], 0  ;;  %s2737_s22 = smov 0   ;;  %s2739_s23 = smov 0  }
   0x5   :  { %s2741_s24 = smov 0   ;;  %s2743_s25 = smov 0  }
   0x6 LB: > { %3981 = sst [smem:[#allocation7_spill]] %s2633_s22  ;;  %s2758_s13 = sadd.s32 4294967295, %s2645_s25   ;;  %s2645_s25 = sphi %s2743_s25, %s3990_s25   ;;  %s2641_s24 = sphi %s2741_s24, %s3992_s24   ;;  %s2637_s23 = sphi %s2739_s23, %s3994_s23   ;;  %s2633_s22 = sphi %s2737_s22, %s3993_s22  }
   0x7   : > { %3982 = sst [smem:[#allocation8_spill]] %s2641_s24  ;;  %s2302_s14 = sadd.s32 4294967294, %s2645_s25  }
   0x8   : > { %s2762_s26 = sadd.s32 1, %s2645_s25   ;;  %s357_s27 = sadd.s32 1, %s2641_s24 }
   0x9   : > { %3983 = sst [smem:[#allocation9_spill]] %s2762_s26  ;;  %s354_s28 = ssub.s32 %s2645_s25, %s2762_s26 }
   0xa   : > { %p367_p0 = scmp.ne.s32.totalorder %s2641_s24, %s2637_s23  ;;  %p355_p1 = scmp.eq.s32.totalorder %s354_s28, 0 }
   0xb   : > { %p368_p2 = scmp.eq.s32.totalorder %s2758_s13, 1  ;;  %p373_p3 = scmp.ne.s32.totalorder %s2637_s23, %s2633_s22 }
   0xc   : > { %p374_p4 = scmp.eq.s32.totalorder %s2302_s14, 1  ;;  %p2305_p7 = scmp.ge.s32.totalorder %s2645_s25, 1 }
   0xd   : > { %s2773_s29 = scalar_select %p355_p1, %s2641_s24, %s357_s27  }
   0xe   : > { %p2775_p5 = por %p368_p2, %p367_p0  ;;  %p2779_p6 = por %p374_p4, %p373_p3 }
   0xf   : > { %3984 = sst [smem:[#allocation10_spill]] %s2773_s29  ;;  %p442_p8 = scmp.lt.s32.totalorder %s2645_s25, 3 }
  0x10   : > { %s3986_s16 = scalar_select %p2779_p6, 1, 0 }
  0x11   : > { %p443_p9 = pnand %p2305_p7, %p442_p8 }
  0x12   : > { %3987 = sst [smem:[#allocation11_spill]] %s3986_s16  ;;  %p490_p10 = scmp.lt.s32.totalorder (!%p443_p9), %s2758_s13, 1 }
  0x13   : > { %446 = sbr.rel (%p443_p9) target bundleno = 1725 (0x6bd), region = 80  ;;  %s2214_s20 = sld [smem:[#allocation2]] (!%p443_p9) }
  0x14   : > { %s2223_s18 = sld [smem:[#allocation3]] (!%p443_p9)  ;;  %s487_s24 = sand.u32 (!%p443_p9), 1, %s2637_s23  }
  0x15   : > { %s2306_s26 = sshll.u32 (!%p443_p9), %s487_s24, 3  ;;  %s2230_s14 = scalar_lea.sflag (!%p443_p9), [#allocation5], %s487_s24 }
  0x16   : > { %s489_s19 = scalar_lea.vmem (!%p443_p9), [#allocation4], %s2306_s26  ;;  %s2650_s28 = smov (!%p443_p9), [#allocation4]  }
  0x17   : > { %s2243_s16 = sshll.u32 (!%p443_p9), %s489_s19, 4  ;;  %s2244_s16 = int_to_ptr.vmem [resolvable:$true] %s2243_s16 }
  0x18   : > { %v2789_v0 = vld [vmem:[%s3961_s1] sm:$0xff]  ;;  %vm499_vm0 = vcmask 130048   ;;  %v615_v1 = vld [vmem:[%s3962_s2 + $0x110] sm:$0xff]  ;;  %v614_v2 = vld [vmem:[%s3962_s2 + $0x108] sm:$0xff]  ;;  %s491_s17 = scalar_select %p490_p10, %s2758_s13, 1  ;;  %v2647_v40 = vmov 0.0   ;;  %v619_v43 = vlaneseq }
  0x19   : > { %2430 = vmatprep.mubr.msk.f32.mxu0 %vm499_vm0, %v2789_v0  ;;  %649 = vmatprep.subr.mxu1 %v615_v1  ;;  %v612_v3 = vld [vmem:[%s3962_s2 + $0xf8] sm:$0xff]  ;;  %v611_v4 = vld [vmem:[%s3962_s2 + $0xf0] sm:$0xff]  ;;  %v609_v5 = vld [vmem:[%s3962_s2 + $0xe0] sm:$0xff]  ;;  %vm634_vm1 = vcmask 785408   ;;  %vm1884_vm2 = vcmask 523264   ;;  %vm2648_vm3 = vmmov 0  }
  0x1a   : > { %650 = vmatpush1.msra.mxu1 %v614_v2  ;;  %v608_v6 = vld [vmem:[%s3962_s2 + $0xd8] sm:$0xff]  ;;  %s2337_s21 = sshll.u32 %s491_s17, 4  ;;  %v606_v7 = vld [vmem:[%s3962_s2 + $0xc8] sm:$0xff]  ;;  %v605_v8 = vld [vmem:[%s3962_s2 + $0xc0] sm:$0xff]  ;;  %705 = vmatprep.mubr.f32.mxu1 %v2647_v40  ;;  %v2917_v44 = vshrl.u32 %v619_v43, 7  ;;  %s2334_s17 = sshll.u32 %s2758_s13, 7 }
  0x1b   : > { %651 = vmatprep.subr.mxu1 %v612_v3  ;;  %s494_s29 = scalar_lea.vmem %s3960_s0, %s2337_s21  ;;  %v603_v11 = vld [vmem:[%s3962_s2 + $0xb0] sm:$0xff]  ;;  %v602_v12 = vld [vmem:[%s3962_s2 + $0xa8] sm:$0xff]  ;;  %v616_v14 = vld [vmem:[%s3962_s2 + $0x118] sm:$0xff]  ;;  %vm2227_vm4 = vcmask 97280   ;;  %s3925_s21 = scalar_lea.hbm %s3975_s15, %s2334_s17 }
  0x1c   : > { %652 = vmatpush1.msra.mxu1 %v611_v4  ;;  %v498_v9 = vld [vmem:[%s494_s29 + $0x8] sm:$0xff]  ;;  %v497_v10 = vld [vmem:[%s494_s29] sm:$0xff]  ;;  %v600_v15 = vld [vmem:[%s3962_s2 + $0x98] sm:$0xff]  ;;  %v629_v45 = vsub.s32 2, %v2917_v44  ;;  %v2926_v48 = vsub.s32 1, %v2917_v44  ;;  %v2929_v49 = vsub.s32 0, %v2917_v44 }
  0x1d   : > { %653 = vmatprep.subr.mxu1 %v609_v5  ;;  %2426 = vmatprep.subr.mxu0 %v498_v9  ;;  %v2830_v13 = vld [vmem:[%s3961_s1 + $0x8] sm:$0xff]  ;;  %v613_v16 = vld [vmem:[%s3962_s2 + $0x100] sm:$0xff]  ;;  %v599_v17 = vld [vmem:[%s3962_s2 + $0x90] sm:$0xff]  ;;  %s2585_s27 = scalar_lea.vmem %s2244_s16, 128  ;;  %s2589_s29 = sshll.u32 %s2650_s28, 4  ;;  %s2590_s29 = int_to_ptr.vmem [resolvable:$false] %s2589_s29 }
  0x1e   : > { %654 = vmatpush1.msra.mxu1 %v608_v6  ;;  %2427 = vmatpush3.msra.mxu0 %v498_v9  ;;  %v597_v18 = vld [vmem:[%s3962_s2 + $0x80] sm:$0xff]  ;;  %v610_v19 = vld [vmem:[%s3962_s2 + $0xe8] sm:$0xff]  ;;  %v596_v20 = vld [vmem:[%s3962_s2 + $0x78] sm:$0xff]  ;;  %p2586_p11 = scmp.ne.s32.totalorder %s2244_s16, %s2585_s27  ;;  %s2591_s13 = scalar_lea.vmem %s2590_s29, 256 }
  0x1f   : > { %655 = vmatprep.subr.mxu1 %v606_v7  ;;  %2428 = vmatprep.subr.mxu0 %v497_v10  ;;  %v594_v21 = vld [vmem:[%s3962_s2 + $0x68] sm:$0xff]  ;;  %v607_v22 = vld [vmem:[%s3962_s2 + $0xd0] sm:$0xff]  ;;  %v593_v23 = vld [vmem:[%s3962_s2 + $0x60] sm:$0xff]  ;;  %p2592_p0 = scmp.lt.s32.totalorder %s2244_s16, %s2590_s29  ;;  %p2593_p1 = scmp.lt.s32.totalorder %s2591_s13, %s2585_s27 }
  0x20   : > { %656 = vmatpush1.msra.mxu1 %v605_v8  ;;  %2429 = vmatpush3.msra.mxu0 %v497_v10  ;;  %v591_v24 = vld [vmem:[%s3962_s2 + $0x50] sm:$0xff]  ;;  %v604_v25 = vld [vmem:[%s3962_s2 + $0xb8] sm:$0xff]  ;;  %v590_v26 = vld [vmem:[%s3962_s2 + $0x48] sm:$0xff]  ;;  %p2587_p12 = pnand %p2586_p11, %p2775_p5 }
  0x21   : > { %657 = vmatprep.subr.mxu1 %v603_v11  ;;  %2431 = vmatmul.mubr.msk.f32.vlgmr.msra.gmra.mxu0 %vm499_vm0, %v2830_v13  ;;  %v588_v27 = vld [vmem:[%s3962_s2 + $0x38] sm:$0xff]  ;;  %v601_v28 = vld [vmem:[%s3962_s2 + $0xa0] sm:$0xff]  ;;  %v587_v29 = vld [vmem:[%s3962_s2 + $0x30] sm:$0xff]  ;;  %p2594_p2 = por %p2593_p1, %p2592_p0 }
  0x22   : > { %658 = vmatpush1.msra.mxu1 %v602_v12  ;;  %2433 = vmatprep.subr.mxu0 %v616_v14  ;;  %v585_v30 = vld [vmem:[%s3962_s2 + $0x20] sm:$0xff]  ;;  %v598_v31 = vld [vmem:[%s3962_s2 + $0x88] sm:$0xff]  ;;  %v595_v32 = vld [vmem:[%s3962_s2 + $0x70] sm:$0xff]  ;;  %p2588_p13 = pneg %p2587_p12 }
  0x23   : > { %2434 = vmatpush3.msra.mxu0 %v616_v14  ;;  %659 = vmatprep.subr.mxu1 %v600_v15  ;;  %v592_v33 = vld [vmem:[%s3962_s2 + $0x58] sm:$0xff]  ;;  %v589_v34 = vld [vmem:[%s3962_s2 + $0x40] sm:$0xff]  ;;  %v586_v36 = vld [vmem:[%s3962_s2 + $0x28] sm:$0xff] }
  0x24   : > { %2435 = vmatprep.subr.mxu0 %v613_v16  ;;  %660 = vmatpush1.msra.mxu1 %v599_v17  ;;  %v584_v35 = vld [vmem:[%s3962_s2 + $0x18] sm:$0xff]  ;;  %v582_v37 = vld [vmem:[%s3962_s2 + $0x8] sm:$0xff]  ;;  %v581_v38 = vld [vmem:[%s3962_s2] sm:$0xff]  ;;  %p2595_p3 = pnand %p2594_p2, %p2588_p13 }
  0x25   : > { %2436 = vmatpush3.msra.mxu0 %v613_v16  ;;  %661 = vmatprep.subr.mxu1 %v597_v18  ;;  %v583_v39 = vld [vmem:[%s3962_s2 + $0x10] sm:$0xff]  ;;  %v617_v46 = vld [vmem:[%s3963_s3] sm:$0x7]  ;;  %v1092_v4 = vld [vmem:[%s3964_s4 + $0x468] sm:$0xff] }
  0x26   : > { %2437 = vmatprep.subr.mxu0 %v610_v19  ;;  %662 = vmatpush1.msra.mxu1 %v596_v20  ;;  %v630_v47 = vrot.slane %v617_v46, %v629_v45  ;;  %v626_v54 = vrot.slane %v617_v46, %v2926_v48  ;;  %v622_v56 = vrot.slane %v617_v46, %v2929_v49  ;;  %v1093_v2 = vld [vmem:[%s3964_s4 + $0x470] sm:$0xff]  ;;  %v1090_v6 = vld [vmem:[%s3964_s4 + $0x458] sm:$0xff]  ;;  %v1087_v10 = vld [vmem:[%s3964_s4 + $0x440] sm:$0xff] }
  0x27   : > { %2438 = vmatpush3.msra.mxu0 %v610_v19  ;;  %663 = vmatprep.subr.mxu1 %v594_v21  ;;  %v1089_v8 = vld [vmem:[%s3964_s4 + $0x450] sm:$0xff]  ;;  %v996_v14 = vld [vmem:[%s3964_s4 + $0x168] sm:$0xff]  ;;  %v994_v15 = vld [vmem:[%s3964_s4 + $0x158] sm:$0xff] }
  0x28   : > { %2439 = vmatprep.subr.mxu0 %v607_v22  ;;  %664 = vmatpush1.msra.mxu1 %v593_v23  ;;  %v997_v12 = vld [vmem:[%s3964_s4 + $0x170] sm:$0xff]  ;;  %v1086_v16 = vld [vmem:[%s3964_s4 + $0x438] sm:$0xff]  ;;  %v1084_v18 = vld [vmem:[%s3964_s4 + $0x428] sm:$0xff] }
  0x29   : > { %2440 = vmatpush3.msra.mxu0 %v607_v22  ;;  %665 = vmatprep.subr.mxu1 %v591_v24  ;;  %v993_v17 = vld [vmem:[%s3964_s4 + $0x150] sm:$0xff]  ;;  %v991_v19 = vld [vmem:[%s3964_s4 + $0x140] sm:$0xff]  ;;  %v990_v20 = vld [vmem:[%s3964_s4 + $0x138] sm:$0xff] }
  0x2a   : > { %2441 = vmatprep.subr.mxu0 %v604_v25  ;;  %666 = vmatpush1.msra.mxu1 %v590_v26  ;;  %v1083_v21 = vld [vmem:[%s3964_s4 + $0x420] sm:$0xff]  ;;  %v988_v22 = vld [vmem:[%s3964_s4 + $0x128] sm:$0xff]  ;;  %v1081_v23 = vld [vmem:[%s3964_s4 + $0x410] sm:$0xff] }
  0x2b   : > { %2442 = vmatpush3.msra.mxu0 %v604_v25  ;;  %667 = vmatprep.subr.mxu1 %v588_v27  ;;  %v987_v24 = vld [vmem:[%s3964_s4 + $0x120] sm:$0xff]  ;;  %v1080_v25 = vld [vmem:[%s3964_s4 + $0x408] sm:$0xff]  ;;  %v985_v26 = vld [vmem:[%s3964_s4 + $0x110] sm:$0xff] }
  0x2c   : > { %2443 = vmatprep.subr.mxu0 %v601_v28  ;;  %668 = vmatpush1.msra.mxu1 %v587_v29  ;;  %v1078_v27 = vld [vmem:[%s3964_s4 + $0x3f8] sm:$0xff]  ;;  %v1077_v29 = vld [vmem:[%s3964_s4 + $0x3f0] sm:$0xff]  ;;  %v1650_v44 = vld [vmem:[%s3966_s6 + $0x260] sm:$0xff] }
  0x2d   : > { %2444 = vmatpush3.msra.mxu0 %v601_v28  ;;  %669 = vmatprep.subr.mxu1 %v585_v30  ;;  %v984_v28 = vld [vmem:[%s3964_s4 + $0x108] sm:$0xff]  ;;  %v982_v30 = vld [vmem:[%s3964_s4 + $0xf8] sm:$0xff]  ;;  %v973_v43 = vld [vmem:[%s3964_s4 + $0xb0] sm:$0xff] }
  0x2e   : > { %2445 = vmatprep.subr.mxu0 %v598_v31  ;;  %670 = vmatpush1.msra.mxu1 %v584_v35  ;;  %v1072_v35 = vld [vmem:[%s3964_s4 + $0x3c8] sm:$0xff]  ;;  %v1066_v46 = vld [vmem:[%s3964_s4 + $0x398] sm:$0xff] }
  0x2f   : > { %2446 = vmatpush3.msra.mxu0 %v598_v31  ;;  %671 = vmatprep.subr.mxu1 %v582_v37  ;;  %v1075_v31 = vld [vmem:[%s3964_s4 + $0x3e0] sm:$0xff] }
  0x30   : > { %2447 = vmatprep.subr.mxu0 %v595_v32  ;;  %672 = vmatpush1.msra.mxu1 %v581_v38  ;;  %v1071_v37 = vld [vmem:[%s3964_s4 + $0x3c0] sm:$0xff]  ;;  %v976_v38 = vld [vmem:[%s3964_s4 + $0xc8] sm:$0xff] }
  0x31   : > { %2448 = vmatpush3.msra.mxu0 %v595_v32  ;;  %v981_v32 = vld [vmem:[%s3964_s4 + $0xf0] sm:$0xff] }
  0x32   : > { %2449 = vmatprep.subr.mxu0 %v592_v33 }
  0x33   : > { %2450 = vmatpush3.msra.mxu0 %v592_v33  ;;  %v1074_v33 = vld [vmem:[%s3964_s4 + $0x3d8] sm:$0xff] }
  0x34   : > { %2451 = vmatprep.subr.mxu0 %v589_v34 }
  0x35   : > { %2452 = vmatpush3.msra.mxu0 %v589_v34  ;;  %v979_v34 = vld [vmem:[%s3964_s4 + $0xe0] sm:$0xff] }
  0x36   : > { %2453 = vmatprep.subr.mxu0 %v586_v36 }
  0x37   : > { %2454 = vmatpush3.msra.mxu0 %v586_v36  ;;  %v978_v36 = vld [vmem:[%s3964_s4 + $0xd8] sm:$0xff] }
  0x38   : > { %2455 = vmatprep.subr.mxu0 %v583_v39 }
  0x39   : > { %2456 = vmatpush3.msra.mxu0 %v583_v39  ;;  %v1069_v39 = vld [vmem:[%s3964_s4 + $0x3b0] sm:$0xff] }
  0xe1   : > { %v2432_v41 = vpop.f32.mrf.mxu0 }
  0xe3   : > { %v572_v42 = vpop.f32.mrf.mxu0 }
  0xe4   : > { %2311 = vmatmul.mubr.msk.f32.vlgmr.msra.gmra.mxu1 %vm634_vm1, %v572_v42  ;;  %2457 = vmatprep.mubr.msk.f32.mxu0 %vm634_vm1, %v572_v42  ;;  %v1068_v42 = vld [vmem:[%s3964_s4 + $0x3a8] sm:$0xff] }
  0xe5   : > { %2458 = vmatmul.mubr.msk.f32.vlgmr.msra.gmra.mxu0 %vm634_vm1, %v2432_v41  ;;  %711 = vmatprep.mubr.f32.mxu1 %v2647_v40 }
  0xe6   : > { %863 = vmatprep.mubr.f32.mxu0 %v2647_v40 }
  0xe8   : > { %2312 = vmatmul.mubr.msk.f32.gmra.mxu1 %vm634_vm1, %v2432_v41  ;;  %v975_v41 = vld [vmem:[%s3964_s4 + $0xc0] sm:$0xff] }
  0xe9   : > { %2464 = vmatprep.mubr.msk.f32.mxu1 %vm499_vm0, %v2789_v0 }
 0x1a4   : > { %v707_v50 = vpop.f32.mrf.mxu1 }
 0x1a5   : > { %v2459_v51 = vpop.f32.mrf.mxu0  ;;  %v708_v3 = vadd.f32 %v707_v50, %v622_v56  ;;  %v1065_v50 = vld [vmem:[%s3964_s4 + $0x390] sm:$0xff] }
 0x1a6   : > { %v790_v52 = vadd.f32 %v2459_v51, %v630_v47  ;;  %v709_v53 = vpop.f32.mrf.mxu1  ;;  %v970_v51 = vld [vmem:[%s3964_s4 + $0x98] sm:$0xff] }
 0x1a7   : > { %v784_v55 = vpop.f32.mrf.mxu0  ;;  %v710_v63 = vadd.f32 %v709_v53, %v626_v54  ;;  %v793_v11 = vmax.f32 %v708_v3, 0.0  ;;  %v969_v53 = vld [vmem:[%s3964_s4 + $0x90] sm:$0xff] }
 0x1a8   : > { %v798_v57 = vmax.f32 %v790_v52, 0.0  ;;  %v785_v58 = vadd.f32 %v784_v55, %v630_v47  ;;  %v713_v59 = vpop.f32.mrf.mxu1  ;;  %v972_v47 = vld [vmem:[%s3964_s4 + $0xa8] sm:$0xff]  ;;  %v1063_v52 = vld [vmem:[%s3964_s4 + $0x380] sm:$0xff]  ;;  %v1053_v3 = vld [vmem:[%s3964_s4 + $0x330] sm:$0xff] }
 0x1a9   : > { %v714_v61 = vadd.f32 %v713_v59, %v622_v56  ;;  %v794_v9 = vmax.f32 %v710_v63, 0.0  ;;  %v967_v55 = vld [vmem:[%s3964_s4 + $0x80] sm:$0xff]  ;;  %v1060_v56 = vld [vmem:[%s3964_s4 + $0x368] sm:$0xff]  ;;  %v961_v63 = vld [vmem:[%s3964_s4 + $0x50] sm:$0xff] }
 0x1aa   : > { %v795_v60 = vmax.f32 %v785_v58, 0.0  ;;  %v715_v62 = vpop.f32.mrf.mxu1  ;;  %2460 = vmatprep.subr.mxu1 %v798_v57  ;;  %v1059_v58 = vld [vmem:[%s3964_s4 + $0x360] sm:$0xff]  ;;  %v964_v59 = vld [vmem:[%s3964_s4 + $0x68] sm:$0xff] }
 0x1ab   : > { %v716_v1 = vadd.f32 %v715_v62, %v626_v54  ;;  %2461 = vmatpush3.msra.mxu1 %v798_v57  ;;  %v796_v7 = vmax.f32 %v714_v61, 0.0  ;;  %v1062_v54 = vld [vmem:[%s3964_s4 + $0x378] sm:$0xff]  ;;  %v963_v61 = vld [vmem:[%s3964_s4 + $0x60] sm:$0xff]  ;;  %v1056_v62 = vld [vmem:[%s3964_s4 + $0x348] sm:$0xff] }
 0x1ac   : > { %2462 = vmatprep.subr.mxu1 %v795_v60  ;;  %v966_v57 = vld [vmem:[%s3964_s4 + $0x78] sm:$0xff] }
 0x1ad   : > { %v797_v5 = vmax.f32 %v716_v1, 0.0  ;;  %2463 = vmatpush3.msra.mxu1 %v795_v60  ;;  %v1057_v60 = vld [vmem:[%s3964_s4 + $0x350] sm:$0xff]  ;;  %v1054_v1 = vld [vmem:[%s3964_s4 + $0x338] sm:$0xff] }
 0x1ae   : > { %2465 = vmatmul.mubr.msk.f32.vlgmr.msra.gmra.mxu1 %vm499_vm0, %v2830_v13  ;;  %1189 = vmatprep.subr.mxu1 %v1093_v2  ;;  %v960_v2 = vld [vmem:[%s3964_s4 + $0x48] sm:$0xff] }
 0x1af   : > { %827 = vmatprep.subr.mxu0 %v797_v5  ;;  %1190 = vmatpush1.msra.mxu1 %v1092_v4  ;;  %v958_v4 = vld [vmem:[%s3964_s4 + $0x38] sm:$0xff]  ;;  %v1051_v5 = vld [vmem:[%s3964_s4 + $0x320] sm:$0xff] }
 0x1b0   : > { %828 = vmatpush1.msra.mxu0 %v796_v7  ;;  %1191 = vmatprep.subr.mxu1 %v1090_v6  ;;  %v957_v6 = vld [vmem:[%s3964_s4 + $0x30] sm:$0xff]  ;;  %v1050_v7 = vld [vmem:[%s3964_s4 + $0x318] sm:$0xff] }
 0x1b1   : > { %829 = vmatprep.subr.mxu0 %v794_v9  ;;  %1192 = vmatpush1.msra.mxu1 %v1089_v8  ;;  %v955_v8 = vld [vmem:[%s3964_s4 + $0x20] sm:$0xff]  ;;  %v954_v9 = vld [vmem:[%s3964_s4 + $0x18] sm:$0xff] }
 0x1b2   : > { %830 = vmatpush1.msra.mxu0 %v793_v11  ;;  %1193 = vmatprep.subr.mxu1 %v1087_v10  ;;  %v952_v10 = vld [vmem:[%s3964_s4 + $0x8] sm:$0xff]  ;;  %v951_v11 = vld [vmem:[%s3964_s4] sm:$0xff] }
 0x1b3   : > { %2315 = vmatmul.mubr.msk.f32.vlgmr.msra.gmra.mxu0 %vm499_vm0, %v2789_v0  ;;  %1112 = vmatprep.subr.mxu0 %v997_v12  ;;  %v1045_v12 = vld [vmem:[%s3964_s4 + $0x2f0] sm:$0xff] }
 0x1b4   : > { %869 = vmatprep.mubr.f32.mxu0 %v2647_v40  ;;  %1113 = vmatpush1.msra.mxu0 %v996_v14  ;;  %v1044_v14 = vld [vmem:[%s3964_s4 + $0x2e8] sm:$0xff] }
 0x1b5   : > { %1114 = vmatprep.subr.mxu0 %v994_v15  ;;  %1194 = vmatpush1.msra.mxu1 %v1086_v16  ;;  %v1042_v15 = vld [vmem:[%s3964_s4 + $0x2d8] sm:$0xff]  ;;  %v1041_v16 = vld [vmem:[%s3964_s4 + $0x2d0] sm:$0xff] }
 0x1b6   : > { %1115 = vmatpush1.msra.mxu0 %v993_v17  ;;  %1195 = vmatprep.subr.mxu1 %v1084_v18  ;;  %v1039_v17 = vld [vmem:[%s3964_s4 + $0x2c0] sm:$0xff]  ;;  %v1038_v18 = vld [vmem:[%s3964_s4 + $0x2b8] sm:$0xff] }
 0x1b7   : > { %2316 = vmatmul.mubr.msk.f32.gmra.mxu0 %vm499_vm0, %v2830_v13  ;;  %1116 = vmatprep.subr.mxu0 %v991_v19  ;;  %v1036_v19 = vld [vmem:[%s3964_s4 + $0x2a8] sm:$0xff] }
 0x1b8   : > { %1117 = vmatpush1.msra.mxu0 %v990_v20  ;;  %1196 = vmatpush1.msra.mxu1 %v1083_v21  ;;  %v1035_v20 = vld [vmem:[%s3964_s4 + $0x2a0] sm:$0xff]  ;;  %v1033_v21 = vld [vmem:[%s3964_s4 + $0x290] sm:$0xff] }
 0x1b9   : > { %1118 = vmatprep.subr.mxu0 %v988_v22  ;;  %1197 = vmatprep.subr.mxu1 %v1081_v23  ;;  %v1032_v22 = vld [vmem:[%s3964_s4 + $0x288] sm:$0xff]  ;;  %v1030_v23 = vld [vmem:[%s3964_s4 + $0x278] sm:$0xff] }
 0x1ba   : > { %1119 = vmatpush1.msra.mxu0 %v987_v24  ;;  %1198 = vmatpush1.msra.mxu1 %v1080_v25  ;;  %v1029_v24 = vld [vmem:[%s3964_s4 + $0x270] sm:$0xff]  ;;  %v1027_v25 = vld [vmem:[%s3964_s4 + $0x260] sm:$0xff] }
 0x1bb   : > { %1120 = vmatprep.subr.mxu0 %v985_v26  ;;  %1199 = vmatprep.subr.mxu1 %v1078_v27  ;;  %v1026_v26 = vld [vmem:[%s3964_s4 + $0x258] sm:$0xff]  ;;  %v1024_v27 = vld [vmem:[%s3964_s4 + $0x248] sm:$0xff] }
 0x1bc   : > { %1121 = vmatpush1.msra.mxu0 %v984_v28  ;;  %1200 = vmatpush1.msra.mxu1 %v1077_v29  ;;  %v1023_v28 = vld [vmem:[%s3964_s4 + $0x240] sm:$0xff]  ;;  %v1021_v29 = vld [vmem:[%s3964_s4 + $0x230] sm:$0xff] }
 0x1bd   : > { %1122 = vmatprep.subr.mxu0 %v982_v30  ;;  %1201 = vmatprep.subr.mxu1 %v1075_v31  ;;  %v1020_v30 = vld [vmem:[%s3964_s4 + $0x228] sm:$0xff]  ;;  %v1018_v31 = vld [vmem:[%s3964_s4 + $0x218] sm:$0xff] }
 0x1be   : > { %1123 = vmatpush1.msra.mxu0 %v981_v32  ;;  %1202 = vmatpush1.msra.mxu1 %v1074_v33  ;;  %v1017_v32 = vld [vmem:[%s3964_s4 + $0x210] sm:$0xff]  ;;  %v1015_v33 = vld [vmem:[%s3964_s4 + $0x200] sm:$0xff] }
 0x1bf   : > { %1124 = vmatprep.subr.mxu0 %v979_v34  ;;  %1203 = vmatprep.subr.mxu1 %v1072_v35  ;;  %v1014_v34 = vld [vmem:[%s3964_s4 + $0x1f8] sm:$0xff]  ;;  %v1012_v35 = vld [vmem:[%s3964_s4 + $0x1e8] sm:$0xff] }
 0x1c0   : > { %1125 = vmatpush1.msra.mxu0 %v978_v36  ;;  %1204 = vmatpush1.msra.mxu1 %v1071_v37  ;;  %v1011_v36 = vld [vmem:[%s3964_s4 + $0x1e0] sm:$0xff]  ;;  %v1009_v37 = vld [vmem:[%s3964_s4 + $0x1d0] sm:$0xff] }
 0x1c1   : > { %1126 = vmatprep.subr.mxu0 %v976_v38  ;;  %1205 = vmatprep.subr.mxu1 %v1069_v39  ;;  %v1048_v38 = vld [vmem:[%s3964_s4 + $0x308] sm:$0xff] }
 0x1c2   : > { %1127 = vmatpush1.msra.mxu0 %v975_v41  ;;  %1206 = vmatpush1.msra.mxu1 %v1068_v42  ;;  %v1008_v39 = vld [vmem:[%s3964_s4 + $0x1c8] sm:$0xff]  ;;  %v1047_v41 = vld [vmem:[%s3964_s4 + $0x300] sm:$0xff]  ;;  %v1006_v42 = vld [vmem:[%s3964_s4 + $0x1b8] sm:$0xff] }
 0x1c3   : > { %1128 = vmatprep.subr.mxu0 %v973_v43  ;;  %1207 = vmatprep.subr.mxu1 %v1066_v46  ;;  %v1046_v43 = vld [vmem:[%s3964_s4 + $0x2f8] sm:$0xff]  ;;  %v1005_v46 = vld [vmem:[%s3964_s4 + $0x1b0] sm:$0xff] }
 0x1c4   : > { %1129 = vmatpush1.msra.mxu0 %v972_v47  ;;  %1208 = vmatpush1.msra.mxu1 %v1065_v50  ;;  %v1003_v47 = vld [vmem:[%s3964_s4 + $0x1a0] sm:$0xff]  ;;  %v1002_v50 = vld [vmem:[%s3964_s4 + $0x198] sm:$0xff] }
 0x1c5   : > { %1130 = vmatprep.subr.mxu0 %v970_v51  ;;  %1209 = vmatprep.subr.mxu1 %v1063_v52  ;;  %v1000_v51 = vld [vmem:[%s3964_s4 + $0x188] sm:$0xff]  ;;  %v999_v52 = vld [vmem:[%s3964_s4 + $0x180] sm:$0xff] }
 0x1c6   : > { %1131 = vmatpush1.msra.mxu0 %v969_v53  ;;  %1210 = vmatpush1.msra.mxu1 %v1062_v54  ;;  %v1094_v53 = vld [vmem:[%s3964_s4 + $0x478] sm:$0xff] }
 0x1c7   : > { %1132 = vmatprep.subr.mxu0 %v967_v55  ;;  %1211 = vmatprep.subr.mxu1 %v1060_v56  ;;  %v998_v55 = vld [vmem:[%s3964_s4 + $0x178] sm:$0xff] }
 0x1c8   : > { %1133 = vmatpush1.msra.mxu0 %v966_v57  ;;  %1212 = vmatpush1.msra.mxu1 %v1059_v58  ;;  %v1043_v57 = vld [vmem:[%s3964_s4 + $0x2e0] sm:$0xff] }
 0x1c9   : > { %1134 = vmatprep.subr.mxu0 %v964_v59  ;;  %1213 = vmatprep.subr.mxu1 %v1057_v60  ;;  %v995_v58 = vld [vmem:[%s3964_s4 + $0x160] sm:$0xff]  ;;  %v1040_v59 = vld [vmem:[%s3964_s4 + $0x2c8] sm:$0xff] }
 0x1ca   : > { %1135 = vmatpush1.msra.mxu0 %v963_v61  ;;  %1214 = vmatpush1.msra.mxu1 %v1056_v62  ;;  %v992_v61 = vld [vmem:[%s3964_s4 + $0x148] sm:$0xff]  ;;  %v1037_v62 = vld [vmem:[%s3964_s4 + $0x2b0] sm:$0xff] }
 0x1cb   : > { %1136 = vmatprep.subr.mxu0 %v961_v63  ;;  %1215 = vmatprep.subr.mxu1 %v1054_v1  ;;  %v989_v1 = vld [vmem:[%s3964_s4 + $0x130] sm:$0xff] }
 0x1cc   : > { %1137 = vmatpush1.msra.mxu0 %v960_v2  ;;  %1216 = vmatpush1.msra.mxu1 %v1053_v3  ;;  %v1034_v2 = vld [vmem:[%s3964_s4 + $0x298] sm:$0xff] }
 0x1cd   : > { %1138 = vmatprep.subr.mxu0 %v958_v4  ;;  %1217 = vmatprep.subr.mxu1 %v1051_v5  ;;  %v1091_v4 = vld [vmem:[%s3964_s4 + $0x460] sm:$0xff]  ;;  %v986_v5 = vld [vmem:[%s3964_s4 + $0x118] sm:$0xff] }
 0x1ce   : > { %1139 = vmatpush1.msra.mxu0 %v957_v6  ;;  %1218 = vmatpush1.msra.mxu1 %v1050_v7  ;;  %v1031_v7 = vld [vmem:[%s3964_s4 + $0x280] sm:$0xff] }
 0x1cf   : > { %1140 = vmatprep.subr.mxu0 %v955_v8  ;;  %1253 = vmatprep.mubr.f32.mxu1 %v2647_v40  ;;  %v1088_v8 = vld [vmem:[%s3964_s4 + $0x448] sm:$0xff] }
 0x1d0   : > { %1141 = vmatpush1.msra.mxu0 %v954_v9  ;;  %1219 = vmatprep.subr.mxu1 %v1048_v38  ;;  %v983_v9 = vld [vmem:[%s3964_s4 + $0x100] sm:$0xff]  ;;  %v1001_v38 = vld [vmem:[%s3964_s4 + $0x190] sm:$0xff] }
 0x1d1   : > { %1142 = vmatprep.subr.mxu0 %v952_v10  ;;  %1220 = vmatpush1.msra.mxu1 %v1047_v41  ;;  %v1028_v10 = vld [vmem:[%s3964_s4 + $0x268] sm:$0xff]  ;;  %v953_v41 = vld [vmem:[%s3964_s4 + $0x10] sm:$0xff] }
 0x1d2   : > { %1143 = vmatpush1.msra.mxu0 %v951_v11  ;;  %2360 = vmatprep.subr.mxu1 %v1046_v43  ;;  %v1085_v11 = vld [vmem:[%s3964_s4 + $0x430] sm:$0xff]  ;;  %v1052_v43 = vld [vmem:[%s3964_s4 + $0x328] sm:$0xff] }
 0x1d3   : > { %1144 = vmatprep.subr.mxu0 %v1045_v12  ;;  %v980_v12 = vld [vmem:[%s3964_s4 + $0xe8] sm:$0xff] }
 0x1d4   : > { %1145 = vmatpush2.msra.mxu0 %v1044_v14  ;;  %v1025_v14 = vld [vmem:[%s3964_s4 + $0x250] sm:$0xff] }
 0x1d5   : > { %1146 = vmatprep.subr.mxu0 %v1042_v15  ;;  %v1082_v15 = vld [vmem:[%s3964_s4 + $0x418] sm:$0xff] }
 0x1d6   : > { %1147 = vmatpush2.msra.mxu0 %v1041_v16  ;;  %v977_v16 = vld [vmem:[%s3964_s4 + $0xd0] sm:$0xff] }
 0x1d7   : > { %1148 = vmatprep.subr.mxu0 %v1039_v17  ;;  %v1022_v17 = vld [vmem:[%s3964_s4 + $0x238] sm:$0xff] }
 0x1d8   : > { %1149 = vmatpush2.msra.mxu0 %v1038_v18  ;;  %v1079_v18 = vld [vmem:[%s3964_s4 + $0x400] sm:$0xff] }
 0x1d9   : > { %1150 = vmatprep.subr.mxu0 %v1036_v19  ;;  %v974_v19 = vld [vmem:[%s3964_s4 + $0xb8] sm:$0xff] }
 0x1da   : > { %1151 = vmatpush2.msra.mxu0 %v1035_v20  ;;  %v1019_v20 = vld [vmem:[%s3964_s4 + $0x220] sm:$0xff] }
 0x1db   : > { %1152 = vmatprep.subr.mxu0 %v1033_v21  ;;  %v1076_v21 = vld [vmem:[%s3964_s4 + $0x3e8] sm:$0xff] }
 0x1dc   : > { %1153 = vmatpush2.msra.mxu0 %v1032_v22  ;;  %v971_v22 = vld [vmem:[%s3964_s4 + $0xa0] sm:$0xff] }
 0x1dd   : > { %1154 = vmatprep.subr.mxu0 %v1030_v23  ;;  %v1016_v23 = vld [vmem:[%s3964_s4 + $0x208] sm:$0xff] }
 0x1de   : > { %1155 = vmatpush2.msra.mxu0 %v1029_v24  ;;  %v1073_v24 = vld [vmem:[%s3964_s4 + $0x3d0] sm:$0xff] }
 0x1df   : > { %1156 = vmatprep.subr.mxu0 %v1027_v25  ;;  %v968_v25 = vld [vmem:[%s3964_s4 + $0x88] sm:$0xff] }
 0x1e0   : > { %1157 = vmatpush2.msra.mxu0 %v1026_v26  ;;  %v1013_v26 = vld [vmem:[%s3964_s4 + $0x1f0] sm:$0xff] }
 0x1e1   : > { %1158 = vmatprep.subr.mxu0 %v1024_v27  ;;  %v1070_v27 = vld [vmem:[%s3964_s4 + $0x3b8] sm:$0xff] }
 0x1e2   : > { %1159 = vmatpush2.msra.mxu0 %v1023_v28  ;;  %v965_v28 = vld [vmem:[%s3964_s4 + $0x70] sm:$0xff] }
 0x1e3   : > { %1160 = vmatprep.subr.mxu0 %v1021_v29  ;;  %v1010_v29 = vld [vmem:[%s3964_s4 + $0x1d8] sm:$0xff] }
 0x1e4   : > { %1161 = vmatpush2.msra.mxu0 %v1020_v30  ;;  %v1067_v30 = vld [vmem:[%s3964_s4 + $0x3a0] sm:$0xff] }
 0x1e5   : > { %1162 = vmatprep.subr.mxu0 %v1018_v31  ;;  %v962_v31 = vld [vmem:[%s3964_s4 + $0x58] sm:$0xff] }
 0x1e6   : > { %1163 = vmatpush2.msra.mxu0 %v1017_v32  ;;  %v1007_v32 = vld [vmem:[%s3964_s4 + $0x1c0] sm:$0xff] }
 0x1e7   : > { %1164 = vmatprep.subr.mxu0 %v1015_v33  ;;  %v1064_v33 = vld [vmem:[%s3964_s4 + $0x388] sm:$0xff] }
 0x1e8   : > { %1165 = vmatpush2.msra.mxu0 %v1014_v34  ;;  %v959_v34 = vld [vmem:[%s3964_s4 + $0x40] sm:$0xff] }
 0x1e9   : > { %1166 = vmatprep.subr.mxu0 %v1012_v35  ;;  %v1004_v35 = vld [vmem:[%s3964_s4 + $0x1a8] sm:$0xff] }
 0x1ea   : > { %1167 = vmatpush2.msra.mxu0 %v1011_v36  ;;  %v1061_v36 = vld [vmem:[%s3964_s4 + $0x370] sm:$0xff] }
 0x1eb   : > { %1168 = vmatprep.subr.mxu0 %v1009_v37  ;;  %v956_v37 = vld [vmem:[%s3964_s4 + $0x28] sm:$0xff] }
 0x1ec   : > { %1169 = vmatpush2.msra.mxu0 %v1008_v39  ;;  %v1058_v39 = vld [vmem:[%s3964_s4 + $0x358] sm:$0xff] }
 0x1ed   : > { %1170 = vmatprep.subr.mxu0 %v1006_v42  ;;  %v1055_v42 = vld [vmem:[%s3964_s4 + $0x340] sm:$0xff] }
 0x1ee   : > { %1171 = vmatpush2.msra.mxu0 %v1005_v46  ;;  %v1049_v46 = vld [vmem:[%s3964_s4 + $0x310] sm:$0xff] }
 0x1ef   : > { %1172 = vmatprep.subr.mxu0 %v1003_v47 }
 0x1f0   : > { %1173 = vmatpush2.msra.mxu0 %v1002_v50 }
 0x1f1   : > { %1174 = vmatprep.subr.mxu0 %v1000_v51  ;;  %v3396_v51 = vld [vmem:[%s3965_s5] sm:$0x7] }
 0x1f2   : > { %1175 = vmatpush2.msra.mxu0 %v999_v52 }
 0x1f3   : > { %2467 = vmatprep.subr.mxu0 %v1094_v53 }
 0x26e   : > { %v3235_v54 = vpop.f32.mrf.mxu1 }
 0x270   : > { %v942_v56 = vpop.f32.mrf.mxu1 }
 0x271   : > { %1254 = vmatmul.mubr.f32.vlgmr.msra.gmra.mxu1 %v942_v56 }
 0x272   : > { %2361 = vmatpush3.msra.mxu1 %v998_v55  ;;  %1259 = vmatprep.mubr.f32.mxu1 %v2647_v40  ;;  %v1104_v55 = vrot.slane %v3396_v51, %v2926_v48 }
 0x273   : > { %2362 = vmatprep.subr.mxu1 %v1043_v57  ;;  %v3250_v60 = vpop.f32.mrf.mxu0 }
 0x274   : > { %2363 = vmatpush3.msra.mxu1 %v995_v58 }
 0x275   : > { %2364 = vmatprep.subr.mxu1 %v1040_v59  ;;  %v867_v63 = vpop.f32.mrf.mxu0  ;;  %1260 = vmatmul.mubr.f32.gmra.mxu1 %v3235_v54 }
 0x276   : > { %2365 = vmatpush3.msra.mxu1 %v992_v61  ;;  %1176 = vmatprep.mubr.f32.mxu0 %v867_v63 }
 0x277   : > { %2366 = vmatprep.subr.mxu1 %v1037_v62  ;;  %v3265_v3 = vpop.f32.mrf.mxu0  ;;  %1177 = vmatmul.mubr.f32.vlgmr.msra.gmra.mxu0 %v3250_v60 }
 0x278   : > { %2367 = vmatpush3.msra.mxu1 %v989_v1  ;;  %2468 = vmatpush3.msra.mxu0 %v1094_v53 }
 0x279   : > { %2368 = vmatprep.subr.mxu1 %v1034_v2  ;;  %1330 = vmatprep.mubr.f32.mxu1 %v867_v63  ;;  %v3274_v6 = vpop.f32.mrf.mxu0 }
 0x27a   : > { %2469 = vmatprep.subr.mxu0 %v1091_v4  ;;  %2369 = vmatpush3.msra.mxu1 %v986_v5 }
 0x27b   : > { %2470 = vmatpush3.msra.mxu0 %v1091_v4  ;;  %1182 = vmatprep.mubr.f32.mxu0 %v3274_v6 }
 0x27c   : > { %2370 = vmatprep.subr.mxu1 %v1031_v7  ;;  %2471 = vmatprep.subr.mxu0 %v1088_v8 }
 0x27d   : > { %1183 = vmatmul.mubr.f32.gmra.mxu0 %v3265_v3  ;;  %2371 = vmatpush3.msra.mxu1 %v983_v9  ;;  %v1669_v9 = vld [vmem:[%s3966_s6 + $0x2f8] sm:$0xff] }
 0x27e   : > { %2472 = vmatpush3.msra.mxu0 %v1088_v8  ;;  %2372 = vmatprep.subr.mxu1 %v1028_v10  ;;  %v1668_v10 = vld [vmem:[%s3966_s6 + $0x2f0] sm:$0xff] }
 0x27f   : > { %2473 = vmatprep.subr.mxu0 %v1085_v11  ;;  %2499 = vmatprep.mubr.f32.mxu0 %v942_v56  ;;  %v1100_v56 = vrot.slane %v3396_v51, %v2929_v49 }
 0x280   : > { %2373 = vmatpush3.msra.mxu1 %v980_v12  ;;  %2474 = vmatpush3.msra.mxu0 %v1085_v11  ;;  %v1667_v11 = vld [vmem:[%s3966_s6 + $0x2e8] sm:$0xff]  ;;  %v1666_v12 = vld [vmem:[%s3966_s6 + $0x2e0] sm:$0xff] }
 0x281   : > { %2374 = vmatprep.subr.mxu1 %v1025_v14  ;;  %2475 = vmatprep.subr.mxu0 %v1082_v15  ;;  %v1665_v14 = vld [vmem:[%s3966_s6 + $0x2d8] sm:$0xff] }
 0x282   : > { %2375 = vmatpush3.msra.mxu1 %v977_v16  ;;  %2476 = vmatpush3.msra.mxu0 %v1082_v15  ;;  %v1664_v15 = vld [vmem:[%s3966_s6 + $0x2d0] sm:$0xff]  ;;  %v1662_v16 = vld [vmem:[%s3966_s6 + $0x2c0] sm:$0xff] }
 0x283   : > { %2376 = vmatprep.subr.mxu1 %v1022_v17  ;;  %2477 = vmatprep.subr.mxu0 %v1079_v18  ;;  %v1661_v17 = vld [vmem:[%s3966_s6 + $0x2b8] sm:$0xff] }
 0x284   : > { %2377 = vmatpush3.msra.mxu1 %v974_v19  ;;  %2478 = vmatpush3.msra.mxu0 %v1079_v18  ;;  %v1660_v18 = vld [vmem:[%s3966_s6 + $0x2b0] sm:$0xff]  ;;  %v1658_v19 = vld [vmem:[%s3966_s6 + $0x2a0] sm:$0xff] }
 0x285   : > { %2378 = vmatprep.subr.mxu1 %v1019_v20  ;;  %2479 = vmatprep.subr.mxu0 %v1076_v21 }
 0x286   : > { %2379 = vmatpush3.msra.mxu1 %v971_v22  ;;  %2480 = vmatpush3.msra.mxu0 %v1076_v21  ;;  %v1657_v21 = vld [vmem:[%s3966_s6 + $0x298] sm:$0xff]  ;;  %v1656_v22 = vld [vmem:[%s3966_s6 + $0x290] sm:$0xff] }
 0x287   : > { %2380 = vmatprep.subr.mxu1 %v1016_v23  ;;  %2481 = vmatprep.subr.mxu0 %v1073_v24 }
 0x288   : > { %2381 = vmatpush3.msra.mxu1 %v968_v25  ;;  %2482 = vmatpush3.msra.mxu0 %v1073_v24  ;;  %v1655_v24 = vld [vmem:[%s3966_s6 + $0x288] sm:$0xff]  ;;  %v1654_v25 = vld [vmem:[%s3966_s6 + $0x280] sm:$0xff] }
 0x289   : > { %2382 = vmatprep.subr.mxu1 %v1013_v26  ;;  %2483 = vmatprep.subr.mxu0 %v1070_v27 }
 0x28a   : > { %2383 = vmatpush3.msra.mxu1 %v965_v28  ;;  %2484 = vmatpush3.msra.mxu0 %v1070_v27  ;;  %v1653_v27 = vld [vmem:[%s3966_s6 + $0x278] sm:$0xff] }
 0x28b   : > { %2384 = vmatprep.subr.mxu1 %v1010_v29  ;;  %2485 = vmatprep.subr.mxu0 %v1067_v30  ;;  %v1108_v29 = vrot.slane %v3396_v51, %v629_v45  ;;  %v1649_v45 = vld [vmem:[%s3966_s6 + $0x258] sm:$0xff]  ;;  %v1602_v51 = vld [vmem:[%s3966_s6 + $0xe0] sm:$0xff] }
 0x28c   : > { %2385 = vmatpush3.msra.mxu1 %v962_v31  ;;  %2486 = vmatpush3.msra.mxu0 %v1067_v30  ;;  %v1652_v30 = vld [vmem:[%s3966_s6 + $0x270] sm:$0xff] }
 0x28d   : > { %2386 = vmatprep.subr.mxu1 %v1007_v32  ;;  %2487 = vmatprep.subr.mxu0 %v1064_v33 }
 0x28e   : > { %2387 = vmatpush3.msra.mxu1 %v959_v34  ;;  %2488 = vmatpush3.msra.mxu0 %v1064_v33  ;;  %v1651_v33 = vld [vmem:[%s3966_s6 + $0x268] sm:$0xff] }
 0x28f   : > { %2388 = vmatprep.subr.mxu1 %v1004_v35  ;;  %2489 = vmatprep.subr.mxu0 %v1061_v36 }
 0x290   : > { %2389 = vmatpush3.msra.mxu1 %v956_v37  ;;  %2490 = vmatpush3.msra.mxu0 %v1061_v36 }
 0x291   : > { %2390 = vmatprep.subr.mxu1 %v1001_v38  ;;  %2491 = vmatprep.subr.mxu0 %v1058_v39 }
 0x292   : > { %2391 = vmatpush3.msra.mxu1 %v953_v41  ;;  %2492 = vmatpush3.msra.mxu0 %v1058_v39 }
 0x293   : > { %1331 = vmatmul.mubr.f32.vlgmr.msra.gmra.mxu1 %v3250_v60  ;;  %2493 = vmatprep.subr.mxu0 %v1055_v42 }
 0x294   : > { %1335 = vmatprep.mubr.f32.mxu1 %v3274_v6  ;;  %2494 = vmatpush3.msra.mxu0 %v1055_v42 }
 0x295   : > { %2495 = vmatprep.subr.mxu0 %v1052_v43 }
 0x296   : > { %2496 = vmatpush3.msra.mxu0 %v1052_v43  ;;  %v1605_v43 = vld [vmem:[%s3966_s6 + $0xf8] sm:$0xff] }
 0x297   : > { %1336 = vmatmul.mubr.f32.gmra.mxu1 %v3265_v3  ;;  %2497 = vmatprep.subr.mxu0 %v1049_v46 }
 0x298   : > { %2498 = vmatpush3.msra.mxu0 %v1049_v46  ;;  %2506 = vmatprep.mubr.msk.f32.mxu1 %vm499_vm0, %v2789_v0  ;;  %v1604_v46 = vld [vmem:[%s3966_s6 + $0xf0] sm:$0xff] }
 0x299   : > { %2500 = vmatmul.mubr.f32.vlgmr.msra.gmra.mxu0 %v3235_v54 }
 0x29a   : > { %1486 = vmatprep.mubr.f32.mxu0 %v2647_v40 }
 0x331   : > { %v1255_v47 = vpop.f32.mrf.mxu1 }
 0x333   : > { %v1257_v52 = vpop.f32.mrf.mxu1 }
 0x335   : > { %v1261_v57 = vpop.f32.mrf.mxu1 }
 0x337   : > { %v1178_v50 = vpop.f32.mrf.mxu0  ;;  %v1263_v63 = vpop.f32.mrf.mxu1 }
 0x338   : > { %v1179_v60 = vadd.f32 %v1178_v50, %v1100_v56  ;;  %v2584_v50 = vld [vmem:[%s3961_s1 + $0x8] sm:$0xff] }
 0x339   : > { %v1180_v53 = vpop.f32.mrf.mxu0 }
 0x33a   : > { %v1181_v54 = vadd.f32 %v1180_v53, %v1104_v55  ;;  %v1256_v4 = vadd.f32 %v1255_v47, %v1179_v60  ;;  %v1603_v47 = vld [vmem:[%s3966_s6 + $0xe8] sm:$0xff]  ;;  %v1600_v53 = vld [vmem:[%s3966_s6 + $0xd0] sm:$0xff]  ;;  %v1593_v60 = vld [vmem:[%s3966_s6 + $0x98] sm:$0xff] }
 0x33c   : > { %v1258_v2 = vadd.f32 %v1257_v52, %v1181_v54  ;;  %v1416_v8 = vmax.f32 %v1256_v4, 0.0  ;;  %v1601_v52 = vld [vmem:[%s3966_s6 + $0xd8] sm:$0xff]  ;;  %v1595_v54 = vld [vmem:[%s3966_s6 + $0xa8] sm:$0xff]  ;;  %v1586_v4 = vld [vmem:[%s3966_s6 + $0x60] sm:$0xff] }
 0x33d   : > { %v1184_v58 = vpop.f32.mrf.mxu0 }
 0x33e   : > { %v1185_v59 = vadd.f32 %v1184_v58, %v1100_v56  ;;  %v1417_v7 = vmax.f32 %v1258_v2, 0.0  ;;  %v1598_v56 = vld [vmem:[%s3966_s6 + $0xc0] sm:$0xff]  ;;  %v1596_v58 = vld [vmem:[%s3966_s6 + $0xb0] sm:$0xff] }
 0x33f   : > { %v1186_v61 = vpop.f32.mrf.mxu0  ;;  %v1588_v2 = vld [vmem:[%s3966_s6 + $0x70] sm:$0xff] }
 0x340   : > { %v1187_v62 = vadd.f32 %v1186_v61, %v1104_v55  ;;  %v1262_v1 = vadd.f32 %v1261_v57, %v1185_v59  ;;  %v1599_v55 = vld [vmem:[%s3966_s6 + $0xc8] sm:$0xff]  ;;  %v1597_v57 = vld [vmem:[%s3966_s6 + $0xb8] sm:$0xff]  ;;  %v1594_v59 = vld [vmem:[%s3966_s6 + $0xa0] sm:$0xff] }
 0x341   : > { %v1592_v61 = vld [vmem:[%s3966_s6 + $0x90] sm:$0xff] }
 0x342   : > { %v1264_v3 = vadd.f32 %v1263_v63, %v1187_v62  ;;  %v1419_v6 = vmax.f32 %v1262_v1, 0.0  ;;  %v1591_v62 = vld [vmem:[%s3966_s6 + $0x88] sm:$0xff]  ;;  %v1590_v63 = vld [vmem:[%s3966_s6 + $0x80] sm:$0xff]  ;;  %v1589_v1 = vld [vmem:[%s3966_s6 + $0x78] sm:$0xff] }
 0x344   : > { %v1420_v5 = vmax.f32 %v1264_v3, 0.0  ;;  %v1587_v3 = vld [vmem:[%s3966_s6 + $0x68] sm:$0xff] }
 0x346   : > { %1450 = vmatprep.subr.mxu0 %v1420_v5  ;;  %v1585_v5 = vld [vmem:[%s3966_s6 + $0x58] sm:$0xff] }
 0x347   : > { %1451 = vmatpush1.msra.mxu0 %v1419_v6  ;;  %v1584_v6 = vld [vmem:[%s3966_s6 + $0x50] sm:$0xff] }
 0x348   : > { %1452 = vmatprep.subr.mxu0 %v1417_v7  ;;  %v1583_v7 = vld [vmem:[%s3966_s6 + $0x48] sm:$0xff] }
 0x349   : > { %1453 = vmatpush1.msra.mxu0 %v1416_v8  ;;  %v1582_v8 = vld [vmem:[%s3966_s6 + $0x40] sm:$0xff] }
 0x34a   : > { %2319 = vmatmul.mubr.msk.f32.vlgmr.msra.gmra.mxu0 %vm499_vm0, %v2789_v0  ;;  %1759 = vmatprep.subr.mxu0 %v1669_v9  ;;  %v1663_v0 = vld [vmem:[%s3966_s6 + $0x2c8] sm:$0xff]  ;;  %v1581_v9 = vld [vmem:[%s3966_s6 + $0x38] sm:$0xff] }
 0x34b   : > { %1492 = vmatprep.mubr.f32.mxu0 %v2647_v40  ;;  %1760 = vmatpush1.msra.mxu0 %v1668_v10  ;;  %v1580_v10 = vld [vmem:[%s3966_s6 + $0x30] sm:$0xff] }
 0x34c   : > { %1761 = vmatprep.subr.mxu0 %v1667_v11  ;;  %v1579_v11 = vld [vmem:[%s3966_s6 + $0x28] sm:$0xff] }
 0x34d   : > { %1762 = vmatpush1.msra.mxu0 %v1666_v12  ;;  %v1578_v12 = vld [vmem:[%s3966_s6 + $0x20] sm:$0xff] }
 0x34e   : > { %2320 = vmatmul.mubr.msk.f32.gmra.mxu0 %vm499_vm0, %v2830_v13  ;;  %1763 = vmatprep.subr.mxu0 %v1665_v14  ;;  %v1659_v13 = vld [vmem:[%s3966_s6 + $0x2a8] sm:$0xff]  ;;  %v1577_v14 = vld [vmem:[%s3966_s6 + $0x18] sm:$0xff] }
 0x34f   : > { %1764 = vmatpush1.msra.mxu0 %v1664_v15  ;;  %1823 = vmatprep.mubr.f32.mxu0 %v2647_v40  ;;  %v1576_v15 = vld [vmem:[%s3966_s6 + $0x10] sm:$0xff] }
 0x350   : > { %1765 = vmatprep.subr.mxu0 %v1663_v0  ;;  %v1575_v0 = vld [vmem:[%s3966_s6 + $0x8] sm:$0xff] }
 0x351   : > { %1766 = vmatpush1.msra.mxu0 %v1662_v16  ;;  %v1574_v16 = vld [vmem:[%s3966_s6] sm:$0xff] }
 0x352   : > { %1767 = vmatprep.subr.mxu0 %v1661_v17  ;;  %v1637_v17 = vld [vmem:[%s3966_s6 + $0x1f8] sm:$0xff] }
 0x353   : > { %v2392_v20 = vpop.f32.mrf.mxu1  ;;  %1768 = vmatpush1.msra.mxu0 %v1660_v18  ;;  %v1636_v18 = vld [vmem:[%s3966_s6 + $0x1f0] sm:$0xff] }
 0x354   : > { %1769 = vmatprep.subr.mxu0 %v1659_v13  ;;  %v1635_v13 = vld [vmem:[%s3966_s6 + $0x1e8] sm:$0xff] }
 0x355   : > { %v2393_v23 = vpop.f32.mrf.mxu1  ;;  %1770 = vmatpush1.msra.mxu0 %v1658_v19  ;;  %v1634_v19 = vld [vmem:[%s3966_s6 + $0x1e0] sm:$0xff] }
 0x356   : > { %1771 = vmatprep.subr.mxu0 %v1657_v21  ;;  %v2394_v28 = vadd.f32 %v2393_v23, %v2392_v20  ;;  %v1633_v20 = vld [vmem:[%s3966_s6 + $0x1d8] sm:$0xff]  ;;  %v1632_v21 = vld [vmem:[%s3966_s6 + $0x1d0] sm:$0xff]  ;;  %v1630_v23 = vld [vmem:[%s3966_s6 + $0x1c0] sm:$0xff] }
 0x357   : > { %v2395_v26 = vpop.f32.mrf.mxu1  ;;  %1772 = vmatpush1.msra.mxu0 %v1656_v22  ;;  %v1631_v22 = vld [vmem:[%s3966_s6 + $0x1c8] sm:$0xff] }
 0x358   : > { %1773 = vmatprep.subr.mxu0 %v1655_v24  ;;  %v1333_v37 = vadd.f32 %v2394_v28, %v1108_v29  ;;  %v1648_v24 = vld [vmem:[%s3966_s6 + $0x250] sm:$0xff]  ;;  %v1646_v28 = vld [vmem:[%s3966_s6 + $0x240] sm:$0xff] }
 0x359   : > { %v2396_v31 = vpop.f32.mrf.mxu1  ;;  %v2501_v32 = vpop.f32.mrf.mxu0  ;;  %1774 = vmatpush1.msra.mxu0 %v1654_v25  ;;  %v1629_v25 = vld [vmem:[%s3966_s6 + $0x1b8] sm:$0xff] }
 0x35a   : > { %v2397_v34 = vadd.f32 %v2396_v31, %v2395_v26  ;;  %1775 = vmatprep.subr.mxu0 %v1653_v27  ;;  %v1647_v26 = vld [vmem:[%s3966_s6 + $0x248] sm:$0xff]  ;;  %v1628_v27 = vld [vmem:[%s3966_s6 + $0x1b0] sm:$0xff]  ;;  %v1626_v31 = vld [vmem:[%s3966_s6 + $0x1a0] sm:$0xff] }
 0x35b   : > { %v1407_v35 = vpop.f32.mrf.mxu0  ;;  %1776 = vmatpush1.msra.mxu0 %v1652_v30  ;;  %v1645_v30 = vld [vmem:[%s3966_s6 + $0x238] sm:$0xff] }
 0x35c   : > { %v1338_v36 = vadd.f32 %v2397_v34, %v1108_v29  ;;  %1777 = vmatprep.subr.mxu0 %v1651_v33  ;;  %v1408_v39 = vadd.f32 %v1407_v35, %v1333_v37  ;;  %v1627_v29 = vld [vmem:[%s3966_s6 + $0x1a8] sm:$0xff]  ;;  %v1625_v34 = vld [vmem:[%s3966_s6 + $0x198] sm:$0xff]  ;;  %v1642_v35 = vld [vmem:[%s3966_s6 + $0x220] sm:$0xff] }
 0x35d   : > { %1778 = vmatpush1.msra.mxu0 %v1650_v44  ;;  %v1643_v33 = vld [vmem:[%s3966_s6 + $0x228] sm:$0xff]  ;;  %v1624_v44 = vld [vmem:[%s3966_s6 + $0x190] sm:$0xff]  ;;  %v1622_v37 = vld [vmem:[%s3966_s6 + $0x180] sm:$0xff] }
 0x35e   : > { %v1413_v38 = vadd.f32 %v2501_v32, %v1338_v36  ;;  %1779 = vmatprep.subr.mxu0 %v1649_v45  ;;  %v1418_v42 = vmax.f32 %v1408_v39, 0.0  ;;  %v1644_v32 = vld [vmem:[%s3966_s6 + $0x230] sm:$0xff]  ;;  %v1623_v45 = vld [vmem:[%s3966_s6 + $0x188] sm:$0xff]  ;;  %v1641_v36 = vld [vmem:[%s3966_s6 + $0x218] sm:$0xff] }
 0x35f   : > { %1780 = vmatpush1.msra.mxu0 %v1648_v24  ;;  %v1620_v39 = vld [vmem:[%s3966_s6 + $0x170] sm:$0xff]  ;;  %v1865_v24 = vld [vmem:[%s3968_s8 + $0x28] sm:$0xff] }
 0x360   : > { %v1421_v41 = vmax.f32 %v1413_v38, 0.0  ;;  %1781 = vmatprep.subr.mxu0 %v1647_v26  ;;  %v1621_v38 = vld [vmem:[%s3966_s6 + $0x178] sm:$0xff]  ;;  %v1864_v26 = vld [vmem:[%s3968_s8 + $0x20] sm:$0xff] }
 0x361   : > { %1782 = vmatpush1.msra.mxu0 %v1646_v28  ;;  %v1863_v28 = vld [vmem:[%s3968_s8 + $0x18] sm:$0xff] }
 0x362   : > { %2502 = vmatprep.subr.mxu1 %v1421_v41  ;;  %1783 = vmatprep.subr.mxu0 %v1645_v30  ;;  %v1862_v30 = vld [vmem:[%s3968_s8 + $0x10] sm:$0xff] }
 0x363   : > { %2503 = vmatpush3.msra.mxu1 %v1421_v41  ;;  %1784 = vmatpush1.msra.mxu0 %v1644_v32  ;;  %v1619_v41 = vld [vmem:[%s3966_s6 + $0x168] sm:$0xff] }
 0x364   : > { %2504 = vmatprep.subr.mxu1 %v1418_v42  ;;  %1785 = vmatprep.subr.mxu0 %v1643_v33  ;;  %v1861_v32 = vld [vmem:[%s3968_s8 + $0x8] sm:$0xff] }
 0x365   : > { %2505 = vmatpush3.msra.mxu1 %v1418_v42  ;;  %1786 = vmatpush1.msra.mxu0 %v1642_v35  ;;  %v1618_v42 = vld [vmem:[%s3966_s6 + $0x160] sm:$0xff]  ;;  %v1967_v33 = vld [vmem:[%s3969_s9 + $0x8] sm:$0xff]  ;;  %v1883_v35 = vld [vmem:[%s3968_s8 + $0xb8] sm:$0xff] }
 0x366   : > { %2507 = vmatmul.mubr.msk.f32.vlgmr.msra.gmra.mxu1 %vm499_vm0, %v2584_v50  ;;  %1682 = vmatprep.subr.mxu1 %v1605_v43  ;;  %v1617_v43 = vld [vmem:[%s3966_s6 + $0x158] sm:$0xff]  ;;  %v1614_v50 = vld [vmem:[%s3966_s6 + $0x140] sm:$0xff] }
 0x367   : > { %1683 = vmatpush1.msra.mxu1 %v1604_v46  ;;  %1787 = vmatprep.subr.mxu0 %v1641_v36  ;;  %v1616_v46 = vld [vmem:[%s3966_s6 + $0x150] sm:$0xff] }
 0x368   : > { %1684 = vmatprep.subr.mxu1 %v1603_v47  ;;  %v1615_v47 = vld [vmem:[%s3966_s6 + $0x148] sm:$0xff]  ;;  %v1882_v36 = vld [vmem:[%s3968_s8 + $0xb0] sm:$0xff] }
 0x369   : > { %1685 = vmatpush1.msra.mxu1 %v1602_v51  ;;  %v1613_v51 = vld [vmem:[%s3966_s6 + $0x138] sm:$0xff] }
 0x36a   : > { %1686 = vmatprep.subr.mxu1 %v1601_v52  ;;  %v1612_v52 = vld [vmem:[%s3966_s6 + $0x130] sm:$0xff] }
 0x36b   : > { %1687 = vmatpush1.msra.mxu1 %v1600_v53  ;;  %v1611_v53 = vld [vmem:[%s3966_s6 + $0x128] sm:$0xff] }
 0x36c   : > { %1688 = vmatprep.subr.mxu1 %v1599_v55  ;;  %v1610_v55 = vld [vmem:[%s3966_s6 + $0x120] sm:$0xff] }
 0x36d   : > { %1689 = vmatpush1.msra.mxu1 %v1598_v56  ;;  %v1609_v56 = vld [vmem:[%s3966_s6 + $0x118] sm:$0xff] }
 0x36e   : > { %1690 = vmatprep.subr.mxu1 %v1597_v57  ;;  %v1608_v57 = vld [vmem:[%s3966_s6 + $0x110] sm:$0xff] }
 0x36f   : > { %1691 = vmatpush1.msra.mxu1 %v1596_v58  ;;  %v1607_v58 = vld [vmem:[%s3966_s6 + $0x108] sm:$0xff] }
 0x370   : > { %1692 = vmatprep.subr.mxu1 %v1595_v54  ;;  %v1606_v54 = vld [vmem:[%s3966_s6 + $0x100] sm:$0xff] }
 0x371   : > { %1693 = vmatpush1.msra.mxu1 %v1594_v59  ;;  %v1640_v59 = vld [vmem:[%s3966_s6 + $0x210] sm:$0xff] }
 0x372   : > { %1694 = vmatprep.subr.mxu1 %v1593_v60  ;;  %1788 = vmatpush1.msra.mxu0 %v1640_v59  ;;  %v1639_v60 = vld [vmem:[%s3966_s6 + $0x208] sm:$0xff] }
 0x373   : > { %1695 = vmatpush1.msra.mxu1 %v1592_v61  ;;  %1789 = vmatprep.subr.mxu0 %v1639_v60  ;;  %v1638_v61 = vld [vmem:[%s3966_s6 + $0x200] sm:$0xff] }
 0x374   : > { %1696 = vmatprep.subr.mxu1 %v1591_v62  ;;  %1790 = vmatpush1.msra.mxu0 %v1638_v61 }
 0x375   : > { %1697 = vmatpush1.msra.mxu1 %v1590_v63  ;;  %1891 = vmatprep.subr.mxu0 %v2647_v40 }
 0x376   : > { %1698 = vmatprep.subr.mxu1 %v1589_v1  ;;  %v1981_v1 = vld [vmem:[%s3969_s9 + $0x78] sm:$0xff] }
 0x377   : > { %1699 = vmatpush1.msra.mxu1 %v1588_v2 }
 0x378   : > { %1700 = vmatprep.subr.mxu1 %v1587_v3 }
 0x379   : > { %1701 = vmatpush1.msra.mxu1 %v1586_v4 }
 0x37a   : > { %1702 = vmatprep.subr.mxu1 %v1585_v5  ;;  %v1875_v5 = vld [vmem:[%s3968_s8 + $0x78] sm:$0xff] }
 0x37b   : > { %1703 = vmatpush1.msra.mxu1 %v1584_v6 }
 0x37c   : > { %1704 = vmatprep.subr.mxu1 %v1583_v7  ;;  %v1874_v7 = vld [vmem:[%s3968_s8 + $0x70] sm:$0xff] }
 0x37d   : > { %1705 = vmatpush1.msra.mxu1 %v1582_v8  ;;  %v1980_v8 = vld [vmem:[%s3969_s9 + $0x70] sm:$0xff] }
 0x37e   : > { %1706 = vmatprep.subr.mxu1 %v1581_v9  ;;  %v1873_v9 = vld [vmem:[%s3968_s8 + $0x68] sm:$0xff] }
 0x37f   : > { %1707 = vmatpush1.msra.mxu1 %v1580_v10  ;;  %v1979_v10 = vld [vmem:[%s3969_s9 + $0x68] sm:$0xff] }
 0x380   : > { %1708 = vmatprep.subr.mxu1 %v1579_v11  ;;  %v1872_v11 = vld [vmem:[%s3968_s8 + $0x60] sm:$0xff] }
 0x381   : > { %1709 = vmatpush1.msra.mxu1 %v1578_v12  ;;  %v1978_v12 = vld [vmem:[%s3969_s9 + $0x60] sm:$0xff] }
 0x382   : > { %1710 = vmatprep.subr.mxu1 %v1577_v14  ;;  %v1871_v14 = vld [vmem:[%s3968_s8 + $0x58] sm:$0xff] }
 0x383   : > { %1711 = vmatpush1.msra.mxu1 %v1576_v15  ;;  %v1977_v15 = vld [vmem:[%s3969_s9 + $0x58] sm:$0xff] }
 0x384   : > { %1712 = vmatprep.subr.mxu1 %v1575_v0  ;;  %v1870_v0 = vld [vmem:[%s3968_s8 + $0x50] sm:$0xff] }
 0x385   : > { %1713 = vmatpush1.msra.mxu1 %v1574_v16  ;;  %v1976_v16 = vld [vmem:[%s3969_s9 + $0x50] sm:$0xff] }
 0x386   : > { %1714 = vmatprep.subr.mxu1 %v1637_v17  ;;  %v1869_v17 = vld [vmem:[%s3968_s8 + $0x48] sm:$0xff] }
 0x387   : > { %1715 = vmatpush2.msra.mxu1 %v1636_v18  ;;  %v1975_v18 = vld [vmem:[%s3969_s9 + $0x48] sm:$0xff] }
 0x388   : > { %1716 = vmatprep.subr.mxu1 %v1635_v13  ;;  %v1868_v13 = vld [vmem:[%s3968_s8 + $0x40] sm:$0xff] }
 0x389   : > { %1717 = vmatpush2.msra.mxu1 %v1634_v19  ;;  %v1974_v19 = vld [vmem:[%s3969_s9 + $0x40] sm:$0xff] }
 0x38a   : > { %1718 = vmatprep.subr.mxu1 %v1633_v20  ;;  %v1867_v20 = vld [vmem:[%s3968_s8 + $0x38] sm:$0xff] }
 0x38b   : > { %1719 = vmatpush2.msra.mxu1 %v1632_v21  ;;  %v1973_v21 = vld [vmem:[%s3969_s9 + $0x38] sm:$0xff] }
 0x38c   : > { %1720 = vmatprep.subr.mxu1 %v1631_v22  ;;  %v1866_v22 = vld [vmem:[%s3968_s8 + $0x30] sm:$0xff] }
 0x38d   : > { %1721 = vmatpush2.msra.mxu1 %v1630_v23  ;;  %v1972_v23 = vld [vmem:[%s3969_s9 + $0x30] sm:$0xff] }
 0x38e   : > { %1722 = vmatprep.subr.mxu1 %v1629_v25  ;;  %v1971_v25 = vld [vmem:[%s3969_s9 + $0x28] sm:$0xff] }
 0x38f   : > { %1723 = vmatpush2.msra.mxu1 %v1628_v27  ;;  %v1970_v27 = vld [vmem:[%s3969_s9 + $0x20] sm:$0xff] }
 0x390   : > { %1724 = vmatprep.subr.mxu1 %v1627_v29  ;;  %v1969_v29 = vld [vmem:[%s3969_s9 + $0x18] sm:$0xff] }
 0x391   : > { %1725 = vmatpush2.msra.mxu1 %v1626_v31  ;;  %v1968_v31 = vld [vmem:[%s3969_s9 + $0x10] sm:$0xff] }
 0x392   : > { %1726 = vmatprep.subr.mxu1 %v1625_v34  ;;  %v1860_v34 = vld [vmem:[%s3968_s8] sm:$0xff] }
 0x393   : > { %1727 = vmatpush2.msra.mxu1 %v1624_v44  ;;  %v1966_v44 = vld [vmem:[%s3969_s9] sm:$0xff] }
 0x394   : > { %1728 = vmatprep.subr.mxu1 %v1623_v45  ;;  %v1989_v45 = vld [vmem:[%s3969_s9 + $0xb8] sm:$0xff] }
 0x395   : > { %1729 = vmatpush2.msra.mxu1 %v1622_v37  ;;  %v1988_v37 = vld [vmem:[%s3969_s9 + $0xb0] sm:$0xff] }
 0x396   : > { %1730 = vmatprep.subr.mxu1 %v1621_v38  ;;  %v1881_v38 = vld [vmem:[%s3968_s8 + $0xa8] sm:$0xff] }
 0x397   : > { %1731 = vmatpush2.msra.mxu1 %v1620_v39  ;;  %v1987_v39 = vld [vmem:[%s3969_s9 + $0xa8] sm:$0xff] }
 0x398   : > { %1732 = vmatprep.subr.mxu1 %v1619_v41  ;;  %v1880_v41 = vld [vmem:[%s3968_s8 + $0xa0] sm:$0xff] }
 0x399   : > { %1733 = vmatpush2.msra.mxu1 %v1618_v42  ;;  %v1986_v42 = vld [vmem:[%s3969_s9 + $0xa0] sm:$0xff] }
 0x39a   : > { %1734 = vmatprep.subr.mxu1 %v1617_v43  ;;  %v1879_v43 = vld [vmem:[%s3968_s8 + $0x98] sm:$0xff] }
 0x39b   : > { %1735 = vmatpush2.msra.mxu1 %v1616_v46  ;;  %v1985_v46 = vld [vmem:[%s3969_s9 + $0x98] sm:$0xff] }
 0x39c   : > { %1736 = vmatprep.subr.mxu1 %v1615_v47  ;;  %v1878_v47 = vld [vmem:[%s3968_s8 + $0x90] sm:$0xff] }
 0x39d   : > { %1737 = vmatpush2.msra.mxu1 %v1614_v50  ;;  %v1984_v50 = vld [vmem:[%s3969_s9 + $0x90] sm:$0xff] }
 0x39e   : > { %1738 = vmatprep.subr.mxu1 %v1613_v51  ;;  %v1877_v51 = vld [vmem:[%s3968_s8 + $0x88] sm:$0xff] }
 0x39f   : > { %1739 = vmatpush2.msra.mxu1 %v1612_v52  ;;  %v1983_v52 = vld [vmem:[%s3969_s9 + $0x88] sm:$0xff] }
 0x3a0   : > { %1740 = vmatprep.subr.mxu1 %v1611_v53  ;;  %v1876_v53 = vld [vmem:[%s3968_s8 + $0x80] sm:$0xff] }
 0x3a1   : > { %1741 = vmatpush2.msra.mxu1 %v1610_v55  ;;  %v1982_v55 = vld [vmem:[%s3969_s9 + $0x80] sm:$0xff] }
 0x3a2   : > { %1742 = vmatprep.subr.mxu1 %v1609_v56 }
 0x3a3   : > { %1743 = vmatpush2.msra.mxu1 %v1608_v57  ;;  %v1670_v57 = vld [vmem:[%s3967_s7] sm:$0x3] }
 0x3a4   : > { %1744 = vmatprep.subr.mxu1 %v1607_v58  ;;  %v1679_v59 = vrot.slane %v1670_v57, %v2926_v48 }
 0x3a5   : > { %1745 = vmatpush2.msra.mxu1 %v1606_v54  ;;  %v1675_v54 = vrot.slane %v1670_v57, %v2929_v49 }
 0x3a6   : > { %1990 = vmatprep.subr.mxu1 %v2647_v40 }
 0x40a   : > { %v1488_v62 = vpop.f32.mrf.mxu0 }
 0x40c   : > { %v1490_v63 = vpop.f32.mrf.mxu0 }
 0x40d   : > { %1746 = vmatprep.mubr.f32.mxu1 %v1490_v63 }
 0x40e   : > { %v1494_v2 = vpop.f32.mrf.mxu0  ;;  %1747 = vmatmul.mubr.f32.vlgmr.msra.gmra.mxu1 %v1488_v62 }
 0x40f   : > { %1991 = vmatpush1.msra.mxu1 %v1981_v1 }
 0x410   : > { %v1496_v3 = vpop.f32.mrf.mxu0  ;;  %1992 = vmatprep.subr.mxu1 %v2647_v40 }
 0x411   : > { %1752 = vmatprep.mubr.f32.mxu1 %v1496_v3  ;;  %1993 = vmatpush1.msra.mxu1 %v1980_v8 }
 0x412   : > { %1753 = vmatmul.mubr.f32.gmra.mxu1 %v1494_v2  ;;  %1994 = vmatprep.subr.mxu1 %v2647_v40 }
 0x413   : > { %1995 = vmatpush1.msra.mxu1 %v1979_v10 }
 0x414   : > { %1996 = vmatprep.subr.mxu1 %v2647_v40 }
 0x415   : > { %1997 = vmatpush1.msra.mxu1 %v1978_v12 }
 0x416   : > { %1998 = vmatprep.subr.mxu1 %v2647_v40 }
 0x417   : > { %1999 = vmatpush1.msra.mxu1 %v1977_v15 }
 0x418   : > { %2000 = vmatprep.subr.mxu1 %v2647_v40 }
 0x419   : > { %2001 = vmatpush1.msra.mxu1 %v1976_v16 }
 0x41a   : > { %2002 = vmatprep.subr.mxu1 %v2647_v40 }
 0x41b   : > { %2003 = vmatpush1.msra.mxu1 %v1975_v18 }
 0x41c   : > { %2004 = vmatprep.subr.mxu1 %v2647_v40 }
 0x41d   : > { %2005 = vmatpush1.msra.mxu1 %v1974_v19 }
 0x41e   : > { %2006 = vmatprep.subr.mxu1 %v2647_v40 }
 0x41f   : > { %2007 = vmatpush1.msra.mxu1 %v1973_v21 }
 0x420   : > { %2008 = vmatprep.subr.mxu1 %v2647_v40 }
 0x421   : > { %2009 = vmatpush1.msra.mxu1 %v1972_v23 }
 0x422   : > { %2010 = vmatprep.subr.mxu1 %v2647_v40 }
 0x423   : > { %2011 = vmatpush1.msra.mxu1 %v1971_v25  ;;  %v2213_v25 = vld [vmem:[%s3972_s12] sm:$0xff] }
 0x424   : > { %2012 = vmatprep.subr.mxu1 %v2647_v40 }
 0x425   : > { %2013 = vmatpush1.msra.mxu1 %v1970_v27 }
 0x426   : > { %v2508_v4 = vpop.f32.mrf.mxu1  ;;  %2014 = vmatprep.subr.mxu1 %v2647_v40 }
 0x427   : > { %2015 = vmatpush1.msra.mxu1 %v1969_v29 }
 0x428   : > { %v1565_v6 = vpop.f32.mrf.mxu1  ;;  %2016 = vmatprep.subr.mxu1 %v2647_v40 }
 0x429   : > { %1824 = vmatmul.mubr.f32.vlgmr.msra.gmra.mxu0 %v1565_v6  ;;  %2017 = vmatpush1.msra.mxu1 %v1968_v31 }
 0x42a   : > { %1829 = vmatprep.mubr.f32.mxu0 %v2647_v40  ;;  %1892 = vmatpush1.msra.mxu0 %v1875_v5 }
 0x42b   : > { %1893 = vmatprep.subr.mxu0 %v2647_v40  ;;  %2018 = vmatprep.subr.mxu1 %v2647_v40 }
 0x42c   : > { %1894 = vmatpush1.msra.mxu0 %v1874_v7  ;;  %2019 = vmatpush1.msra.mxu1 %v1967_v33 }
 0x42d   : > { %1830 = vmatmul.mubr.f32.gmra.mxu0 %v2508_v4  ;;  %1895 = vmatprep.subr.mxu0 %v2647_v40 }
 0x42e   : > { %1896 = vmatpush1.msra.mxu0 %v1873_v9  ;;  %2020 = vmatprep.subr.mxu1 %v2647_v40 }
 0x42f   : > { %1897 = vmatprep.subr.mxu0 %v2647_v40  ;;  %2021 = vmatpush1.msra.mxu1 %v1966_v44 }
 0x430   : > { %1898 = vmatpush1.msra.mxu0 %v1872_v11  ;;  %2038 = vmatprep.subr.mxu1 %v2647_v40 }
 0x431   : > { %1899 = vmatprep.subr.mxu0 %v2647_v40  ;;  %2039 = vmatpush2.msra.mxu1 %v1989_v45  ;;  %v2065_v45 = vld [vmem:[%s3970_s10] sm:$0xff] }
 0x432   : > { %1900 = vmatpush1.msra.mxu0 %v1871_v14  ;;  %2040 = vmatprep.subr.mxu1 %v2647_v40 }
 0x433   : > { %1901 = vmatprep.subr.mxu0 %v2647_v40  ;;  %2041 = vmatpush2.msra.mxu1 %v1988_v37 }
 0x434   : > { %1902 = vmatpush1.msra.mxu0 %v1870_v0  ;;  %2042 = vmatprep.subr.mxu1 %v2647_v40 }
 0x435   : > { %1903 = vmatprep.subr.mxu0 %v2647_v40  ;;  %2043 = vmatpush2.msra.mxu1 %v1987_v39 }
 0x436   : > { %1904 = vmatpush1.msra.mxu0 %v1869_v17  ;;  %2044 = vmatprep.subr.mxu1 %v2647_v40 }
 0x437   : > { %1905 = vmatprep.subr.mxu0 %v2647_v40  ;;  %2045 = vmatpush2.msra.mxu1 %v1986_v42  ;;  %v2224_v42 = vstv %s2223_s18 }
 0x438   : > { %1906 = vmatpush1.msra.mxu0 %v1868_v13  ;;  %2046 = vmatprep.subr.mxu1 %v2647_v40 }
 0x439   : > { %1907 = vmatprep.subr.mxu0 %v2647_v40  ;;  %2047 = vmatpush2.msra.mxu1 %v1985_v46 }
 0x43a   : > { %1908 = vmatpush1.msra.mxu0 %v1867_v20  ;;  %2048 = vmatprep.subr.mxu1 %v2647_v40 }
 0x43b   : > { %1909 = vmatprep.subr.mxu0 %v2647_v40  ;;  %2049 = vmatpush2.msra.mxu1 %v1984_v50 }
 0x43c   : > { %1910 = vmatpush1.msra.mxu0 %v1866_v22  ;;  %2050 = vmatprep.subr.mxu1 %v2647_v40 }
 0x43d   : > { %1911 = vmatprep.subr.mxu0 %v2647_v40  ;;  %2051 = vmatpush2.msra.mxu1 %v1983_v52 }
 0x43e   : > { %1912 = vmatpush1.msra.mxu0 %v1865_v24  ;;  %2052 = vmatprep.subr.mxu1 %v2647_v40  ;;  %v2649_v24 = vmov 0  }
 0x43f   : > { %1913 = vmatprep.subr.mxu0 %v2647_v40  ;;  %2053 = vmatpush2.msra.mxu1 %v1982_v55 }
 0x440   : > { %1914 = vmatpush1.msra.mxu0 %v1864_v26  ;;  %2565 = vset.pattern.permute.xlu0 %v2649_v24  ;;  %v2215_v26 = vstv %s2214_s20 }
 0x441   : > { %1915 = vmatprep.subr.mxu0 %v2647_v40  ;;  %v2216_v27 = vmul.f32 %v2215_v26, %v2213_v25 }
 0x442   : > { %1916 = vmatpush1.msra.mxu0 %v1863_v28 }
 0x443   : > { %1917 = vmatprep.subr.mxu0 %v2647_v40  ;;  %2219 = vperm.xlu0 %2565, %v2216_v27  }
 0x444   : > { %1918 = vmatpush1.msra.mxu0 %v1862_v30 }
 0x445   : > { %1919 = vmatprep.subr.mxu0 %v2647_v40 }
 0x446   : > { %1920 = vmatpush1.msra.mxu0 %v1861_v32 }
 0x447   : > { %1921 = vmatprep.subr.mxu0 %v2647_v40 }
 0x448   : > { %1922 = vmatpush1.msra.mxu0 %v1860_v34  ;;  %v2066_v34 = vld [vmem:[%s3971_s11] sm:$0xff] }
 0x449   : > { %1939 = vmatprep.subr.mxu0 %v2647_v40 }
 0x44a   : > { %1940 = vmatpush2.msra.mxu0 %v1883_v35 }
 0x44b   : > { %1941 = vmatprep.subr.mxu0 %v2647_v40 }
 0x44c   : > { %1942 = vmatpush2.msra.mxu0 %v1882_v36 }
 0x44d   : > { %1943 = vmatprep.subr.mxu0 %v2647_v40 }
 0x44e   : > { %1944 = vmatpush2.msra.mxu0 %v1881_v38 }
 0x44f   : > { %1945 = vmatprep.subr.mxu0 %v2647_v40 }
 0x450   : > { %1946 = vmatpush2.msra.mxu0 %v1880_v41 }
 0x451   : > { %1947 = vmatprep.subr.mxu0 %v2647_v40 }
 0x452   : > { %1948 = vmatpush2.msra.mxu0 %v1879_v43 }
 0x453   : > { %1949 = vmatprep.subr.mxu0 %v2647_v40 }
 0x454   : > { %1950 = vmatpush2.msra.mxu0 %v1878_v47 }
 0x455   : > { %1951 = vmatprep.subr.mxu0 %v2647_v40 }
 0x456   : > { %1952 = vmatpush2.msra.mxu0 %v1877_v51 }
 0x457   : > { %1953 = vmatprep.subr.mxu0 %v2647_v40 }
 0x458   : > { %1954 = vmatpush2.msra.mxu0 %v1876_v53 }
 0x459   : > { %2509 = vmatprep.subr.mxu0 %v2647_v40 }
 0x4be   : > { %v2220_v39 = vpop.permute.xlu0 %2219 }
 0x4ce   : > { %v1748_v56 = vpop.f32.mrf.mxu1 }
 0x4cf   : > { %v1749_v61 = vadd.f32 %v1748_v56, %v1675_v54 }
 0x4d0   : > { %v1750_v58 = vpop.f32.mrf.mxu1 }
 0x4d1   : > { %v1751_v63 = vadd.f32 %v1750_v58, %v1679_v59 }
 0x4d2   : > { %v1754_v60 = vpop.f32.mrf.mxu1 }
 0x4d3   : > { %v1755_v4 = vadd.f32 %v1754_v60, %v1675_v54 }
 0x4d4   : > { %v1756_v2 = vpop.f32.mrf.mxu1 }
 0x4d5   : > { %v1757_v8 = vadd.f32 %v1756_v2, %v1679_v59 }
 0x4e9   : > { %v1825_v62 = vpop.f32.mrf.mxu0 }
 0x4ea   : > { %v1826_v1 = vadd.f32 %v1825_v62, %v1749_v61 }
 0x4eb   : > { %v1827_v3 = vpop.f32.mrf.mxu0 }
 0x4ec   : > { %v2323_v5 = vmul.f32 -1.442695, %v1826_v1  ;;  %v1828_v6 = vadd.f32 %v1827_v3, %v1751_v63 }
 0x4ed   : > { %v1831_v7 = vpop.f32.mrf.mxu0 }
 0x4ee   : > { %2566 = vpow2.f32 %v2323_v5  ;;  %v2324_v9 = vmul.f32 -1.442695, %v1828_v6  ;;  %v1832_v10 = vadd.f32 %v1831_v7, %v1755_v4 }
 0x4ef   : > { %v1833_v11 = vpop.f32.mrf.mxu0 }
 0x4f0   : > { %2568 = vpow2.f32 %v2324_v9  ;;  %v2325_v49 = vmul.f32 -1.442695, %v1832_v10  ;;  %v1834_v12 = vadd.f32 %v1833_v11, %v1757_v8 }
 0x4f2   : > { %2570 = vpow2.f32 %v2325_v49  ;;  %v2326_v48 = vmul.f32 -1.442695, %v1834_v12 }
 0x4f4   : > { %2572 = vpow2.f32 %v2326_v48 }
 0x4fb   : > { %v2567_v14 = vpop.eup %2566 }
 0x4fc   : > { %v1848_v0 = vadd.f32 1.0, %v2567_v14 }
 0x4fd   : > { %v2569_v15 = vpop.eup %2568 }
 0x4fe   : > { %v1849_v16 = vadd.f32 1.0, %v2569_v15 }
 0x4ff   : > { %v2571_v17 = vpop.eup %2570 }
 0x500   : > { %2574 = vrcp.f32 %v1849_v16  ;;  %v1850_v13 = vadd.f32 1.0, %v2571_v17 }
 0x501   : > { %v2573_v18 = vpop.eup %2572  ;;  %2576 = vrcp.f32 %v1848_v0 }
 0x502   : > { %v1851_v19 = vadd.f32 1.0, %v2573_v18 }
 0x504   : > { %2578 = vrcp.f32 %v1851_v19 }
 0x505   : > { %2580 = vrcp.f32 %v1850_v13 }
 0x50d   : > { %v2575_v20 = vpop.eup %2574 }
 0x50e   : > { %v2577_v21 = vpop.eup %2576  ;;  %2327 = vmatprep.mubr.msk.f32.mxu0 %vm1884_vm2, %v2575_v20  ;;  %2329 = vmatprep.mubr.msk.f32.mxu1 %vm1884_vm2, %v2575_v20 }
 0x50f   : > { %1956 = vmatmul.mubr.f32.vlgmr.msra.gmra.mxu0 %v2577_v21  ;;  %2055 = vmatmul.mubr.f32.vlgmr.msra.gmra.mxu1 %v2577_v21 }
 0x511   : > { %v2579_v22 = vpop.eup %2578 }
 0x512   : > { %v2581_v23 = vpop.eup %2580  ;;  %2328 = vmatprep.mubr.msk.f32.mxu0 %vm1884_vm2, %v2579_v22  ;;  %2330 = vmatprep.mubr.msk.f32.mxu1 %vm1884_vm2, %v2579_v22 }
 0x513   : > { %1961 = vmatmul.mubr.f32.gmra.mxu0 %v2581_v23  ;;  %2060 = vmatmul.mubr.f32.gmra.mxu1 %v2581_v23 }
 0x514   : > { %2513 = vmatprep.mubr.msk.f32.mxu0 %vm2648_vm3, %v2647_v40 }
 0x5cf   : > { %v1957_v28 = vpop.f32.mrf.mxu0  ;;  %v2056_v29 = vpop.f32.mrf.mxu1 }
 0x5d1   : > { %v1959_v30 = vpop.f32.mrf.mxu0  ;;  %v2058_v31 = vpop.f32.mrf.mxu1 }
 0x5d3   : > { %v1962_v32 = vpop.f32.mrf.mxu0  ;;  %v2061_v33 = vpop.f32.mrf.mxu1 }
 0x5d4   : > { %2510 = vmatpush3.msra.mxu0 %v2061_v33 }
 0x5d5   : > { %v1964_v44 = vpop.f32.mrf.mxu0  ;;  %v2063_v35 = vpop.f32.mrf.mxu1  ;;  %2511 = vmatprep.subr.mxu0 %v2647_v40 }
 0x5d6   : > { %2512 = vmatpush3.msra.mxu0 %v2056_v29 }
 0x5d7   : > { %2516 = vmatprep.subr.mxu0 %v2647_v40  ;;  %2514 = vmatmul.mubr.msk.f32.vlgmr.msra.gmra.mxu0 %vm499_vm0, %v2066_v34 }
 0x5d8   : > { %2517 = vmatpush3.msra.mxu0 %v1962_v32  ;;  %2520 = vmatprep.mubr.msk.f32.mxu0 %vm2648_vm3, %v2647_v40 }
 0x5d9   : > { %2518 = vmatprep.subr.mxu0 %v2647_v40 }
 0x5da   : > { %2519 = vmatpush3.msra.mxu0 %v1957_v28 }
 0x5db   : > { %2521 = vmatmul.mubr.msk.f32.vlgmr.msra.gmra.mxu0 %vm499_vm0, %v2065_v45 }
 0x697   : > { %v2136_v36 = vpop.f32.mrf.mxu0 }
 0x699   : > { %v2515_v37 = vpop.f32.mrf.mxu0 }
 0x69b   : > { %v2209_v38 = vpop.f32.mrf.mxu0 }
 0x69c   : > { %v2210_v41 = vadd.f32 %v2209_v38, %v2136_v36 }
 0x69d   : > { %v2522_v43 = vpop.f32.mrf.mxu0 }
 0x69e   : > { %v2222_v46 = vadd.f32 %v2220_v39, %v2210_v41 }
 0x6a0   : > { %v2225_v47 = vadd.f32 %v2224_v42, %v2222_v46 }
 0x6a2   : > { %2582 = vtanh.f32 %v2225_v47 }
 0x6af   : > { %v2583_v40 = vpop.eup %2582 }
 0x6b0   : > { %2228 = vst.msk [vmem:[%s489_s19] sm:$0xff] %vm2227_vm4, %v2583_v40 }
 0x6b1   : > { %2598 = shalt.err (!%p2595_p3)
}
 0x6b2   : > { %s2599_s18 = scalar_lea.hbm %s3925_s21, 128  ;;  %s2603_s17 = scalar_lea.hbm %s3975_s15, 256 }
 0x6b3   : > { %p2600_p4 = scmp.ne.s32.totalorder %s3925_s21, %s2599_s18  ;;  %p2604_p9 = scmp.lt.s32.totalorder %s3925_s21, %s3975_s15 }
 0x6b4   : > { %p2605_p10 = scmp.lt.s32.totalorder %s2603_s17, %s2599_s18 }
 0x6b5   : > { %p2601_p7 = pnand %p2600_p4, %p2775_p5 }
 0x6b6   : > { %p2606_p11 = por %p2605_p10, %p2604_p9 }
 0x6b7   : > { %p2602_p8 = pneg %p2601_p7 }
 0x6b9   : > { %p2607_p12 = pnand %p2606_p11, %p2602_p8 }
 0x6bb   : > { %2610 = shalt.err (!%p2607_p12)
}
 0x6bc   : > { %2523 = dma.vmem_to_hbm [thread:$0]  (%p2775_p5), %s2244_s16, 128, %s3925_s21, %s2230_s14  }
 0x6bd PF: > { %s3988_s22 = sld [smem:[#allocation7_spill]]  ;;  %p2529_p13 = scmp.ge.s32.totalorder %s2645_s25, 2 }
 0x6bf   : > { %p2526_p0 = pnand %p2529_p13, %p2779_p6 }
 0x6c1   : > { %p2527_p1 = pneg %p2526_p0 }
 0x6c3   : > { %s2255_s28 = sand.u32 1, %s3988_s22  }
 0x6c4   : > { %s2256_s29 = scalar_lea.sflag [#allocation5], %s2255_s28 }
 0x6c5   : > { %2628 = dma.done.wait (%p2527_p1), %s2256_s29, 128  }
 0x6c6   : > { %2630 = vsyncadd (%p2527_p1), %s2256_s29, 4294967168  ;;  %s3990_s25 = sld [smem:[#allocation9_spill]]  ;;  %s3993_s22 = smov %s2637_s23 }
 0x6c7   : > { %s3991_s13 = sld [smem:[#allocation8_spill]] }
 0x6c8   : > { %s3992_s24 = sld [smem:[#allocation10_spill]] }
 0x6cc   : > { %p27_p2 = scmp.ge.s32.totalorder %s3990_s25, 4  }
 0x6cd   : > { %s3994_s23 = smov %s3991_s13 }
 0x6ce   :  { %29 = sbr.rel (!%p27_p2) target bundleno = 6 (0x6), region = 115 }
 0x6d3   :  { %2261 = vsyncpa [#allocation5], 1 }
 0x6d4   :  { %2263 = vsyncpa [#allocation5 + $0x1], 1 }

</bundles_post_ra>
